<compile_context>
chip_gen: v5e
topology: v5e:2x2
jax: 0.10.0
libtpu: 0.0.40
codegen_flags: <defaults>
</compile_context>

<pallas_src>
import functools

import jax
import jax.numpy as jnp
from jax.experimental import pallas as pl
from jax.experimental.pallas import tpu as pltpu

LANE = 128  # TPU lane width; feature dims are padded to a multiple of this.


def _round_up(n, m):
    return ((n + m - 1) // m) * m


def _build_layer_plan(h_dims):
    """Return list of (in_dim, out_dim, activation) matching the torch module."""
    plan = []
    enco = h_dims[:-1]
    for i, o in zip(enco, enco[1:]):                 # encoder Linear+ReLU blocks
        plan.append((i, o, "relu"))
    plan.append((h_dims[-2], h_dims[-1], "none"))    # encoder bottleneck (no act)
    deco = list(reversed(h_dims))[:-1]
    for i, o in zip(deco, deco[1:]):                 # decoder Linear+ReLU blocks
        plan.append((i, o, "relu"))
    plan.append((h_dims[1], h_dims[0], "tanh"))      # decoder head + Tanh
    return plan


def _num_tensorcores():
    """Heuristic TC count per chip: 2 on v7x, 1 on v5e/v6e."""
    try:
        kind = jax.devices()[0].device_kind.lower()
    except Exception:
        return 1
    return 2 if "v7" in kind else 1


def _pick_batch_tile(b_dim, n_cores):
    """Batch tile (rows): multiple of 16 (bf16 sublane pack), capped at 1024."""
    b16 = _round_up(max(b_dim, 16), 16)
    if n_cores > 1:
        # Split across both TensorCores (grid >= 2) so neither idles on v7x.
        return min(_round_up(pl.cdiv(b16, n_cores), 16), 1024)
    # Single TC: one big tile (grid=(1,)) — fewer grid steps = less overhead.
    return min(b16, 1024)


# --------------------------------------------------------------------------
# Kernel
# --------------------------------------------------------------------------
def _autoencoder_kernel(x_ref, *refs, activations):
    # refs = (w0, b0, w1, b1, ..., o_ref); weights bf16 (P,P), biases f32 (1,P)
    o_ref = refs[-1]
    params = refs[:-1]
    n_layers = len(activations)

    h = x_ref[...]  # (TB, P) bf16 tile of the batch — already MXU-ready
    for li, act in enumerate(activations):
        w = params[2 * li][...]          # (P, P) bf16, VMEM-resident
        b = params[2 * li + 1][...]      # (1, P) f32, VMEM-resident
        # bf16 MXU matmul with f32 accumulation; elementwise tail stays f32.
        acc = jnp.dot(h, w, preferred_element_type=jnp.float32) + b
        if act == "relu":
            acc = jnp.maximum(acc, 0.0)
        elif act == "tanh":
            acc = jnp.tanh(acc)
        # "none" -> identity (encoder bottleneck)
        h = acc.astype(jnp.bfloat16) if li + 1 < n_layers else acc
    o_ref[...] = h.astype(o_ref.dtype)


# --------------------------------------------------------------------------
# Parameter preparation (one-time: pad + cast)
# --------------------------------------------------------------------------
def prepare_params(params):
    """Pad weights/biases to (P,P)/(1,P) lane-dense layout, cast weights bf16.

    Do this ONCE at init; pass the result to `autoencoder_forward`.
    """
    n_layers = len(params) // 2
    dims = [params[0].shape[0]] + [params[2 * i].shape[1]
                                   for i in range(n_layers)]
    p = _round_up(max(dims), LANE)

    padded = []
    for li in range(n_layers):
        w = params[2 * li]
        b = params[2 * li + 1]
        di, do = w.shape
        w_p = jnp.zeros((p, p), jnp.bfloat16).at[:di, :do].set(
            w.astype(jnp.bfloat16))
        b_p = jnp.zeros((1, p), jnp.float32).at[:, :do].set(
            b.reshape(1, -1).astype(jnp.float32))
        padded.extend([w_p, b_p])
    return tuple(padded)


# --------------------------------------------------------------------------
# Forward (jitted: pad-x + pallas_call + slice fuse into one dispatch)
# --------------------------------------------------------------------------
@functools.partial(jax.jit, static_argnames=("activations", "tb"))
def _forward_impl(x, padded_params, activations, tb):
    b_dim, d0 = x.shape
    n_layers = len(activations)
    p = padded_params[0].shape[0]

    b_pad = _round_up(b_dim, tb)
    grid = (b_pad // tb,)

    # Zero-pad batch/feature dims into a bf16 buffer (lane-dense, half the DMA).
    x_p = jnp.zeros((b_pad, p), jnp.bfloat16).at[:b_dim, :d0].set(
        x.astype(jnp.bfloat16))

    # BlockSpecs: batch-tiled x/out, grid-invariant (VMEM-resident) params.
    in_specs = [pl.BlockSpec((tb, p), lambda i: (i, 0))]
    for _ in range(n_layers):
        in_specs.append(pl.BlockSpec((p, p), lambda i: (0, 0)))   # weight
        in_specs.append(pl.BlockSpec((1, p), lambda i: (0, 0)))   # bias
    out_spec = pl.BlockSpec((tb, p), lambda i: (i, 0))

    # VMEM limit sized from the actual footprint (hygiene; generous margin).
    param_bytes = sum(int(a.size) * a.dtype.itemsize for a in padded_params)
    tile_in = tb * p * 2        # bf16 x tile
    tile_out = tb * p * 4       # f32 out tile
    vmem_est = 2 * (tile_in + tile_out) + 2 * param_bytes + 4 * tile_out
    vmem_limit = int(min(max(8 << 20, 2 * vmem_est), 64 << 20))

    kernel = functools.partial(_autoencoder_kernel, activations=activations)

    out_p = pl.pallas_call(
        kernel,
        out_shape=jax.ShapeDtypeStruct((b_pad, p), jnp.float32),
        grid=grid,
        in_specs=in_specs,
        out_specs=out_spec,
        compiler_params=pltpu.CompilerParams(
            dimension_semantics=("parallel",),
            vmem_limit_bytes=vmem_limit,
        ),
    )(x_p, *padded_params)

    # Slice fuses into the jitted program (no extra dispatch).
    return out_p[:b_dim, :d0]


def autoencoder_forward(x, padded_params, activations, *, tb=None):
    """x: (B, d0) float32.  padded_params: output of prepare_params."""
    if tb is None:
        tb = _pick_batch_tile(x.shape[0], _num_tensorcores())
    tb = max(16, _round_up(int(tb), 16))   # bf16 sublane pack + (8,128) rule
    return _forward_impl(x, tuple(padded_params), tuple(activations), tb)


# --------------------------------------------------------------------------
# Init + references
# --------------------------------------------------------------------------
def init_params(key, plan):
    """Deterministic parameter init: W ~ N(0, 0.1), b ~ N(0, 0.01)."""
    params = []
    for (d_in, d_out, _) in plan:
        kw, kb, key = jax.random.split(key, 3)
        w = jax.random.normal(kw, (d_in, d_out), dtype=jnp.float32) * 0.1
        b = jax.random.normal(kb, (1, d_out), dtype=jnp.float32) * 0.01
        params.extend([w, b])
    return params


def reference_forward_bf16(x, params, activations):
    """Pure-JAX reference with the same bf16-matmul / f32-accumulate numerics."""
    h = x.astype(jnp.float32)
    for li, act in enumerate(activations):
        w = params[2 * li].astype(jnp.bfloat16)
        b = params[2 * li + 1].astype(jnp.float32)
        h = jnp.dot(h.astype(jnp.bfloat16), w,
                    preferred_element_type=jnp.float32) + b
        if act == "relu":
            h = jnp.maximum(h, 0.0)
        elif act == "tanh":
            h = jnp.tanh(h)
    return h


def reference_forward_f32(x, params, activations):
    """Full-precision reference (module semantics)."""
    h = x.astype(jnp.float32)
    for li, act in enumerate(activations):
        h = h @ params[2 * li] + params[2 * li + 1]
        if act == "relu":
            h = jnp.maximum(h, 0.0)
        elif act == "tanh":
            h = jnp.tanh(h)
    return h


if __name__ == "__main__":
    # hDims chain consistent with the module; batch chosen so the grid is
    # (1,) on single-TC chips and (2,) (one tile per TensorCore) on v7x.
    h_dims = [64, 32, 16, 8]
    batch = 512

    plan = _build_layer_plan(h_dims)
    activations = tuple(a for (_, _, a) in plan)

    key = jax.random.PRNGKey(0)
    kx, kp = jax.random.split(key)
    x = jax.random.normal(kx, (batch, h_dims[0]), dtype=jnp.float32)
    params = init_params(kp, plan)

    # One-time parameter padding/casting (hoisted out of the forward path).
    padded_params = prepare_params(params)

    out = autoencoder_forward(x, padded_params, activations)
    out = jax.block_until_ready(out)
    assert out.shape == (batch, h_dims[0]), out.shape

    ref_bf16 = reference_forward_bf16(x, params, activations)
    assert jnp.allclose(out, ref_bf16, atol=1e-3, rtol=1e-3), \
        "mismatch vs bf16-matmul JAX reference"

    ref_f32 = reference_forward_f32(x, params, activations)
    assert jnp.allclose(out, ref_f32, atol=3e-2, rtol=3e-2), \
        "mismatch vs f32 JAX reference (module semantics)"

    print("KERNEL_OK")
</pallas_src>

<mosaic_0001>
module attributes {stable_mosaic.version = 11 : i64} {
  func.func @_autoencoder_kernel(%arg0: i32, %arg1: memref<512x128xbf16, #tpu.memory_space<vmem>>, %arg2: memref<128x128xbf16, #tpu.memory_space<vmem>>, %arg3: memref<1x128xf32, #tpu.memory_space<vmem>>, %arg4: memref<128x128xbf16, #tpu.memory_space<vmem>>, %arg5: memref<1x128xf32, #tpu.memory_space<vmem>>, %arg6: memref<128x128xbf16, #tpu.memory_space<vmem>>, %arg7: memref<1x128xf32, #tpu.memory_space<vmem>>, %arg8: memref<128x128xbf16, #tpu.memory_space<vmem>>, %arg9: memref<1x128xf32, #tpu.memory_space<vmem>>, %arg10: memref<128x128xbf16, #tpu.memory_space<vmem>>, %arg11: memref<1x128xf32, #tpu.memory_space<vmem>>, %arg12: memref<128x128xbf16, #tpu.memory_space<vmem>>, %arg13: memref<1x128xf32, #tpu.memory_space<vmem>>, %arg14: memref<512x128xf32, #tpu.memory_space<vmem>>) attributes {dimension_semantics = [#tpu.dimension_semantics<parallel>], iteration_bounds = array<i64: 1>, scalar_prefetch = 0 : i64, scratch_operands = 0 : i64, tpu.core_type = #tpu.core_type<tc>, window_params = [{transform_indices = @transform_0, window_bounds = array<i64: 512, 128>}, {pipeline_mode = #tpu.pipeline_mode<synchronous>, transform_indices = @transform_1, window_bounds = array<i64: 128, 128>}, {pipeline_mode = #tpu.pipeline_mode<synchronous>, transform_indices = @transform_2, window_bounds = array<i64: 1, 128>}, {pipeline_mode = #tpu.pipeline_mode<synchronous>, transform_indices = @transform_3, window_bounds = array<i64: 128, 128>}, {pipeline_mode = #tpu.pipeline_mode<synchronous>, transform_indices = @transform_4, window_bounds = array<i64: 1, 128>}, {pipeline_mode = #tpu.pipeline_mode<synchronous>, transform_indices = @transform_5, window_bounds = array<i64: 128, 128>}, {pipeline_mode = #tpu.pipeline_mode<synchronous>, transform_indices = @transform_6, window_bounds = array<i64: 1, 128>}, {pipeline_mode = #tpu.pipeline_mode<synchronous>, transform_indices = @transform_7, window_bounds = array<i64: 128, 128>}, {pipeline_mode = #tpu.pipeline_mode<synchronous>, transform_indices = @transform_8, window_bounds = array<i64: 1, 128>}, {pipeline_mode = #tpu.pipeline_mode<synchronous>, transform_indices = @transform_9, window_bounds = array<i64: 128, 128>}, {pipeline_mode = #tpu.pipeline_mode<synchronous>, transform_indices = @transform_10, window_bounds = array<i64: 1, 128>}, {pipeline_mode = #tpu.pipeline_mode<synchronous>, transform_indices = @transform_11, window_bounds = array<i64: 128, 128>}, {pipeline_mode = #tpu.pipeline_mode<synchronous>, transform_indices = @transform_12, window_bounds = array<i64: 1, 128>}, {transform_indices = @transform_13, window_bounds = array<i64: 512, 128>}]} {
    %c0 = arith.constant 0 : index
    %c0_0 = arith.constant 0 : index
    %0 = vector.load %arg1[%c0, %c0_0] : memref<512x128xbf16, #tpu.memory_space<vmem>>, vector<512x128xbf16>
    %c0_1 = arith.constant 0 : index
    %c0_2 = arith.constant 0 : index
    %1 = vector.load %arg2[%c0_1, %c0_2] : memref<128x128xbf16, #tpu.memory_space<vmem>>, vector<128x128xbf16>
    %c0_3 = arith.constant 0 : index
    %c0_4 = arith.constant 0 : index
    %2 = vector.load %arg3[%c0_3, %c0_4] : memref<1x128xf32, #tpu.memory_space<vmem>>, vector<1x128xf32>
    %cst = arith.constant dense<0.000000e+00> : vector<512x128xf32>
    %3 = tpu.matmul %0, %1, %cst {dimension_numbers = #tpu.dot_dimension_numbers<[1], [0], [0], [1], [0, 0, 1, 1], [], []>} : vector<512x128xbf16>, vector<128x128xbf16>, vector<512x128xf32> -> vector<512x128xf32>
    %4 = vector.broadcast %2 : vector<1x128xf32> to vector<512x128xf32>
    %5 = arith.addf %3, %4 : vector<512x128xf32>
    %cst_5 = arith.constant 0.000000e+00 : f32
    %6 = vector.broadcast %cst_5 : f32 to vector<512x128xf32>
    %7 = arith.maximumf %5, %6 : vector<512x128xf32>
    %8 = arith.truncf %7 : vector<512x128xf32> to vector<512x128xbf16>
    %c0_6 = arith.constant 0 : index
    %c0_7 = arith.constant 0 : index
    %9 = vector.load %arg4[%c0_6, %c0_7] : memref<128x128xbf16, #tpu.memory_space<vmem>>, vector<128x128xbf16>
    %c0_8 = arith.constant 0 : index
    %c0_9 = arith.constant 0 : index
    %10 = vector.load %arg5[%c0_8, %c0_9] : memref<1x128xf32, #tpu.memory_space<vmem>>, vector<1x128xf32>
    %cst_10 = arith.constant dense<0.000000e+00> : vector<512x128xf32>
    %11 = tpu.matmul %8, %9, %cst_10 {dimension_numbers = #tpu.dot_dimension_numbers<[1], [0], [0], [1], [0, 0, 1, 1], [], []>} : vector<512x128xbf16>, vector<128x128xbf16>, vector<512x128xf32> -> vector<512x128xf32>
    %12 = vector.broadcast %10 : vector<1x128xf32> to vector<512x128xf32>
    %13 = arith.addf %11, %12 : vector<512x128xf32>
    %cst_11 = arith.constant 0.000000e+00 : f32
    %14 = vector.broadcast %cst_11 : f32 to vector<512x128xf32>
    %15 = arith.maximumf %13, %14 : vector<512x128xf32>
    %16 = arith.truncf %15 : vector<512x128xf32> to vector<512x128xbf16>
    %c0_12 = arith.constant 0 : index
    %c0_13 = arith.constant 0 : index
    %17 = vector.load %arg6[%c0_12, %c0_13] : memref<128x128xbf16, #tpu.memory_space<vmem>>, vector<128x128xbf16>
    %c0_14 = arith.constant 0 : index
    %c0_15 = arith.constant 0 : index
    %18 = vector.load %arg7[%c0_14, %c0_15] : memref<1x128xf32, #tpu.memory_space<vmem>>, vector<1x128xf32>
    %cst_16 = arith.constant dense<0.000000e+00> : vector<512x128xf32>
    %19 = tpu.matmul %16, %17, %cst_16 {dimension_numbers = #tpu.dot_dimension_numbers<[1], [0], [0], [1], [0, 0, 1, 1], [], []>} : vector<512x128xbf16>, vector<128x128xbf16>, vector<512x128xf32> -> vector<512x128xf32>
    %20 = vector.broadcast %18 : vector<1x128xf32> to vector<512x128xf32>
    %21 = arith.addf %19, %20 : vector<512x128xf32>
    %22 = arith.truncf %21 : vector<512x128xf32> to vector<512x128xbf16>
    %c0_17 = arith.constant 0 : index
    %c0_18 = arith.constant 0 : index
    %23 = vector.load %arg8[%c0_17, %c0_18] : memref<128x128xbf16, #tpu.memory_space<vmem>>, vector<128x128xbf16>
    %c0_19 = arith.constant 0 : index
    %c0_20 = arith.constant 0 : index
    %24 = vector.load %arg9[%c0_19, %c0_20] : memref<1x128xf32, #tpu.memory_space<vmem>>, vector<1x128xf32>
    %cst_21 = arith.constant dense<0.000000e+00> : vector<512x128xf32>
    %25 = tpu.matmul %22, %23, %cst_21 {dimension_numbers = #tpu.dot_dimension_numbers<[1], [0], [0], [1], [0, 0, 1, 1], [], []>} : vector<512x128xbf16>, vector<128x128xbf16>, vector<512x128xf32> -> vector<512x128xf32>
    %26 = vector.broadcast %24 : vector<1x128xf32> to vector<512x128xf32>
    %27 = arith.addf %25, %26 : vector<512x128xf32>
    %cst_22 = arith.constant 0.000000e+00 : f32
    %28 = vector.broadcast %cst_22 : f32 to vector<512x128xf32>
    %29 = arith.maximumf %27, %28 : vector<512x128xf32>
    %30 = arith.truncf %29 : vector<512x128xf32> to vector<512x128xbf16>
    %c0_23 = arith.constant 0 : index
    %c0_24 = arith.constant 0 : index
    %31 = vector.load %arg10[%c0_23, %c0_24] : memref<128x128xbf16, #tpu.memory_space<vmem>>, vector<128x128xbf16>
    %c0_25 = arith.constant 0 : index
    %c0_26 = arith.constant 0 : index
    %32 = vector.load %arg11[%c0_25, %c0_26] : memref<1x128xf32, #tpu.memory_space<vmem>>, vector<1x128xf32>
    %cst_27 = arith.constant dense<0.000000e+00> : vector<512x128xf32>
    %33 = tpu.matmul %30, %31, %cst_27 {dimension_numbers = #tpu.dot_dimension_numbers<[1], [0], [0], [1], [0, 0, 1, 1], [], []>} : vector<512x128xbf16>, vector<128x128xbf16>, vector<512x128xf32> -> vector<512x128xf32>
    %34 = vector.broadcast %32 : vector<1x128xf32> to vector<512x128xf32>
    %35 = arith.addf %33, %34 : vector<512x128xf32>
    %cst_28 = arith.constant 0.000000e+00 : f32
    %36 = vector.broadcast %cst_28 : f32 to vector<512x128xf32>
    %37 = arith.maximumf %35, %36 : vector<512x128xf32>
    %38 = arith.truncf %37 : vector<512x128xf32> to vector<512x128xbf16>
    %c0_29 = arith.constant 0 : index
    %c0_30 = arith.constant 0 : index
    %39 = vector.load %arg12[%c0_29, %c0_30] : memref<128x128xbf16, #tpu.memory_space<vmem>>, vector<128x128xbf16>
    %c0_31 = arith.constant 0 : index
    %c0_32 = arith.constant 0 : index
    %40 = vector.load %arg13[%c0_31, %c0_32] : memref<1x128xf32, #tpu.memory_space<vmem>>, vector<1x128xf32>
    %cst_33 = arith.constant dense<0.000000e+00> : vector<512x128xf32>
    %41 = tpu.matmul %38, %39, %cst_33 {dimension_numbers = #tpu.dot_dimension_numbers<[1], [0], [0], [1], [0, 0, 1, 1], [], []>} : vector<512x128xbf16>, vector<128x128xbf16>, vector<512x128xf32> -> vector<512x128xf32>
    %42 = vector.broadcast %40 : vector<1x128xf32> to vector<512x128xf32>
    %43 = arith.addf %41, %42 : vector<512x128xf32>
    %44 = math.tanh %43 : vector<512x128xf32>
    %c0_34 = arith.constant 0 : index
    %c0_35 = arith.constant 0 : index
    %45 = vector.load %arg14[%c0_34, %c0_35] : memref<512x128xf32, #tpu.memory_space<vmem>>, vector<512x128xf32>
    tpu.vector_store %arg14[%c0_34, %c0_35], %44 {strides = array<i32>} : memref<512x128xf32, #tpu.memory_space<vmem>>, vector<512x128xf32>,
    return
  }
  func.func @transform_0(%arg0: i32) -> (i32, i32) {
    %c0_i32 = arith.constant 0 : i32
    %c0_i32_0 = arith.constant 0 : i32
    return %arg0, %c0_i32 : i32, i32
  }
  func.func @transform_1(%arg0: i32) -> (i32, i32) {
    %c0_i32 = arith.constant 0 : i32
    %c0_i32_0 = arith.constant 0 : i32
    %c0_i32_1 = arith.constant 0 : i32
    return %c0_i32, %c0_i32_0 : i32, i32
  }
  func.func @transform_2(%arg0: i32) -> (i32, i32) {
    %c0_i32 = arith.constant 0 : i32
    %c0_i32_0 = arith.constant 0 : i32
    %c0_i32_1 = arith.constant 0 : i32
    return %c0_i32, %c0_i32_0 : i32, i32
  }
  func.func @transform_3(%arg0: i32) -> (i32, i32) {
    %c0_i32 = arith.constant 0 : i32
    %c0_i32_0 = arith.constant 0 : i32
    %c0_i32_1 = arith.constant 0 : i32
    return %c0_i32, %c0_i32_0 : i32, i32
  }
  func.func @transform_4(%arg0: i32) -> (i32, i32) {
    %c0_i32 = arith.constant 0 : i32
    %c0_i32_0 = arith.constant 0 : i32
    %c0_i32_1 = arith.constant 0 : i32
    return %c0_i32, %c0_i32_0 : i32, i32
  }
  func.func @transform_5(%arg0: i32) -> (i32, i32) {
    %c0_i32 = arith.constant 0 : i32
    %c0_i32_0 = arith.constant 0 : i32
    %c0_i32_1 = arith.constant 0 : i32
    return %c0_i32, %c0_i32_0 : i32, i32
  }
  func.func @transform_6(%arg0: i32) -> (i32, i32) {
    %c0_i32 = arith.constant 0 : i32
    %c0_i32_0 = arith.constant 0 : i32
    %c0_i32_1 = arith.constant 0 : i32
    return %c0_i32, %c0_i32_0 : i32, i32
  }
  func.func @transform_7(%arg0: i32) -> (i32, i32) {
    %c0_i32 = arith.constant 0 : i32
    %c0_i32_0 = arith.constant 0 : i32
    %c0_i32_1 = arith.constant 0 : i32
    return %c0_i32, %c0_i32_0 : i32, i32
  }
  func.func @transform_8(%arg0: i32) -> (i32, i32) {
    %c0_i32 = arith.constant 0 : i32
    %c0_i32_0 = arith.constant 0 : i32
    %c0_i32_1 = arith.constant 0 : i32
    return %c0_i32, %c0_i32_0 : i32, i32
  }
  func.func @transform_9(%arg0: i32) -> (i32, i32) {
    %c0_i32 = arith.constant 0 : i32
    %c0_i32_0 = arith.constant 0 : i32
    %c0_i32_1 = arith.constant 0 : i32
    return %c0_i32, %c0_i32_0 : i32, i32
  }
  func.func @transform_10(%arg0: i32) -> (i32, i32) {
    %c0_i32 = arith.constant 0 : i32
    %c0_i32_0 = arith.constant 0 : i32
    %c0_i32_1 = arith.constant 0 : i32
    return %c0_i32, %c0_i32_0 : i32, i32
  }
  func.func @transform_11(%arg0: i32) -> (i32, i32) {
    %c0_i32 = arith.constant 0 : i32
    %c0_i32_0 = arith.constant 0 : i32
    %c0_i32_1 = arith.constant 0 : i32
    return %c0_i32, %c0_i32_0 : i32, i32
  }
  func.func @transform_12(%arg0: i32) -> (i32, i32) {
    %c0_i32 = arith.constant 0 : i32
    %c0_i32_0 = arith.constant 0 : i32
    %c0_i32_1 = arith.constant 0 : i32
    return %c0_i32, %c0_i32_0 : i32, i32
  }
  func.func @transform_13(%arg0: i32) -> (i32, i32) {
    %c0_i32 = arith.constant 0 : i32
    %c0_i32_0 = arith.constant 0 : i32
    return %arg0, %c0_i32 : i32, i32
  }
}

</mosaic_0001>

<bundles_post_ra>
// kernel: _forward_impl.1
= control target key start
LH: loop header
LB: loop body
LE: loop exit
PB: predicated region body
PF: predicated region fallthrough
CT: control target
= control target key end

     0   :  { %s3850_s1 = inlined_call_operand.vmem [shape: bf16[128,128], index: 1, kind: input, shape index: {}]   ;;  %s3851_s2 = inlined_call_operand.vmem [shape: f32[1,128], index: 2, kind: input, shape index: {}]   ;;  %s3852_s5 = inlined_call_operand.vmem [shape: bf16[128,128], index: 5, kind: input, shape index: {}]   ;;  %s3853_s0 = inlined_call_operand.vmem [shape: bf16[512,128], index: 0, kind: input, shape index: {}]   ;;  %s3854_s3 = inlined_call_operand.vmem [shape: bf16[128,128], index: 3, kind: input, shape index: {}]   ;;  %s3855_s7 = inlined_call_operand.vmem [shape: bf16[128,128], index: 7, kind: input, shape index: {}]   ;;  %s3856_s4 = inlined_call_operand.vmem [shape: f32[1,128], index: 4, kind: input, shape index: {}]   ;;  %s3857_s9 = inlined_call_operand.vmem [shape: bf16[128,128], index: 9, kind: input, shape index: {}]   ;;  %s3858_s6 = inlined_call_operand.vmem [shape: f32[1,128], index: 6, kind: input, shape index: {}]   ;;  %s3859_s11 = inlined_call_operand.vmem [shape: bf16[128,128], index: 11, kind: input, shape index: {}]   ;;  %s3860_s8 = inlined_call_operand.vmem [shape: f32[1,128], index: 8, kind: input, shape index: {}]   ;;  %s3861_s10 = inlined_call_operand.vmem [shape: f32[1,128], index: 10, kind: input, shape index: {}]   ;;  %s3862_s12 = inlined_call_operand.vmem [shape: f32[1,128], index: 12, kind: input, shape index: {}]   ;;  %s3863_s13 = inlined_call_operand.vmem [shape: f32[512,128], index: 13, kind: output, shape index: {}]  }
   0x1   :  { %v2629_v0 = vld [vmem:[%s3850_s1 + $0x38] sm:$0xff]  ;;  %v2628_v1 = vld [vmem:[%s3850_s1 + $0x30] sm:$0xff]  ;;  %v2627_v2 = vld [vmem:[%s3850_s1 + $0x28] sm:$0xff] }
   0x2   :  { %368 = vmatpush.bf16.msra.mxu0 %v2629_v0  ;;  %2670 = vmatpush.bf16.msra.mxu2 %v2629_v0  ;;  %v2626_v3 = vld [vmem:[%s3850_s1 + $0x20] sm:$0xff]  ;;  %v2625_v4 = vld [vmem:[%s3850_s1 + $0x18] sm:$0xff]  ;;  %v2624_v5 = vld [vmem:[%s3850_s1 + $0x10] sm:$0xff] }
   0x3   :  { %v2623_v6 = vld [vmem:[%s3850_s1 + $0x8] sm:$0xff]  ;;  %v2622_v7 = vld [vmem:[%s3850_s1] sm:$0xff]  ;;  %v2645_v8 = vld [vmem:[%s3852_s5 + $0x38] sm:$0xff] }
   0x4   :  { %v2590_v9 = vld [vmem:[%s3853_s0] sm:$0xff]  ;;  %v2591_v11 = vld [vmem:[%s3853_s0 + $0x8] sm:$0xff]  ;;  %v2644_v13 = vld [vmem:[%s3852_s5 + $0x30] sm:$0xff] }
   0x5   :  { %v2606_v10 = vld [vmem:[%s3853_s0 + $0x80] sm:$0xff]  ;;  %v2607_v12 = vld [vmem:[%s3853_s0 + $0x88] sm:$0xff]  ;;  %v2592_v14 = vld [vmem:[%s3853_s0 + $0x10] sm:$0xff] }
   0x6   :  { %369 = vmatpush.bf16.msra.mxu0 %v2628_v1  ;;  %2671 = vmatpush.bf16.msra.mxu2 %v2628_v1  ;;  %v2608_v15 = vld [vmem:[%s3853_s0 + $0x90] sm:$0xff]  ;;  %v2593_v16 = vld [vmem:[%s3853_s0 + $0x18] sm:$0xff]  ;;  %v2643_v18 = vld [vmem:[%s3852_s5 + $0x28] sm:$0xff] }
   0x7   :  { %v2609_v17 = vld [vmem:[%s3853_s0 + $0x98] sm:$0xff]  ;;  %v2594_v19 = vld [vmem:[%s3853_s0 + $0x20] sm:$0xff]  ;;  %v2595_v22 = vld [vmem:[%s3853_s0 + $0x28] sm:$0xff] }
   0x8   :  { %v2610_v20 = vld [vmem:[%s3853_s0 + $0xa0] sm:$0xff]  ;;  %v2637_v21 = vld [vmem:[%s3854_s3 + $0x38] sm:$0xff]  ;;  %v2611_v23 = vld [vmem:[%s3853_s0 + $0xa8] sm:$0xff] }
   0x9   :  { %701 = vmatpush.bf16.msra.mxu1 %v2637_v21  ;;  %2678 = vmatpush.bf16.msra.mxu3 %v2637_v21  ;;  %v2636_v24 = vld [vmem:[%s3854_s3 + $0x30] sm:$0xff]  ;;  %v2642_v25 = vld [vmem:[%s3852_s5 + $0x20] sm:$0xff]  ;;  %v2635_v26 = vld [vmem:[%s3854_s3 + $0x28] sm:$0xff] }
   0xa   :  { %370 = vmatpush.bf16.msra.mxu0 %v2627_v2  ;;  %2672 = vmatpush.bf16.msra.mxu2 %v2627_v2  ;;  %v2634_v27 = vld [vmem:[%s3854_s3 + $0x20] sm:$0xff]  ;;  %v2633_v28 = vld [vmem:[%s3854_s3 + $0x18] sm:$0xff]  ;;  %v2596_v29 = vld [vmem:[%s3853_s0 + $0x30] sm:$0xff] }
   0xb   :  { %v2612_v30 = vld [vmem:[%s3853_s0 + $0xb0] sm:$0xff]  ;;  %v2631_v32 = vld [vmem:[%s3854_s3 + $0x8] sm:$0xff]  ;;  %v2630_v33 = vld [vmem:[%s3854_s3] sm:$0xff] }
   0xc   :  { %v2632_v31 = vld [vmem:[%s3854_s3 + $0x10] sm:$0xff]  ;;  %v2597_v34 = vld [vmem:[%s3853_s0 + $0x38] sm:$0xff]  ;;  %v2598_v37 = vld [vmem:[%s3853_s0 + $0x40] sm:$0xff] }
   0xd   :  { %702 = vmatpush.bf16.msra.mxu1 %v2636_v24  ;;  %2679 = vmatpush.bf16.msra.mxu3 %v2636_v24  ;;  %v2613_v35 = vld [vmem:[%s3853_s0 + $0xb8] sm:$0xff]  ;;  %v2614_v38 = vld [vmem:[%s3853_s0 + $0xc0] sm:$0xff]  ;;  %v2599_v52 = vld [vmem:[%s3853_s0 + $0x48] sm:$0xff] }
   0xe   :  { %371 = vmatpush.bf16.msra.mxu0 %v2626_v3  ;;  %2673 = vmatpush.bf16.msra.mxu2 %v2626_v3  ;;  %v2641_v36 = vld [vmem:[%s3852_s5 + $0x18] sm:$0xff]  ;;  %v3015_v40 = vld [vmem:[%s3851_s2] ss:$0 sm:$0xff]  ;;  %v2615_v54 = vld [vmem:[%s3853_s0 + $0xc8] sm:$0xff] }
   0xf   :  { %v2653_v48 = vld [vmem:[%s3855_s7 + $0x38] sm:$0xff]  ;;  %v2640_v1 = vld [vmem:[%s3852_s5 + $0x10] sm:$0xff] }
  0x10   :  { %v2617_v24 = vld [vmem:[%s3853_s0 + $0xd8] sm:$0xff] }
  0x11   :  { %703 = vmatpush.bf16.msra.mxu1 %v2635_v26  ;;  %2680 = vmatpush.bf16.msra.mxu3 %v2635_v26 }
  0x12   :  { %372 = vmatpush.bf16.msra.mxu0 %v2625_v4  ;;  %2674 = vmatpush.bf16.msra.mxu2 %v2625_v4 }
  0x15   :  { %704 = vmatpush.bf16.msra.mxu1 %v2634_v27  ;;  %2681 = vmatpush.bf16.msra.mxu3 %v2634_v27 }
  0x16   :  { %373 = vmatpush.bf16.msra.mxu0 %v2624_v5  ;;  %2675 = vmatpush.bf16.msra.mxu2 %v2624_v5  ;;  %v2600_v5 = vld [vmem:[%s3853_s0 + $0x50] sm:$0xff] }
  0x19   :  { %705 = vmatpush.bf16.msra.mxu1 %v2633_v28  ;;  %2682 = vmatpush.bf16.msra.mxu3 %v2633_v28 }
  0x1a   :  { %374 = vmatpush.bf16.msra.mxu0 %v2623_v6  ;;  %2676 = vmatpush.bf16.msra.mxu2 %v2623_v6 }
  0x1d   :  { %706 = vmatpush.bf16.msra.mxu1 %v2632_v31  ;;  %2683 = vmatpush.bf16.msra.mxu3 %v2632_v31 }
  0x1e   :  { %375 = vmatpush.bf16.msra.mxu0 %v2622_v7  ;;  %2677 = vmatpush.bf16.msra.mxu2 %v2622_v7  ;;  %v2616_v7 = vld [vmem:[%s3853_s0 + $0xd0] sm:$0xff] }
  0x21   :  { %376 = vmatmul.bf16.vlgmr.msra.gmra.mxu0 %v2590_v9  ;;  %456 = vmatmul.bf16.vlgmr.msra.gmra.mxu2 %v2606_v10 }
  0x22   :  { %1034 = vmatpush.bf16.msrb.mxu2 %v2645_v8  ;;  %707 = vmatpush.bf16.msra.mxu1 %v2631_v32 }
  0x23   :  { %2684 = vmatpush.bf16.msra.mxu3 %v2631_v32 }
  0x26   :  { %1035 = vmatpush.bf16.msrb.mxu2 %v2644_v13  ;;  %708 = vmatpush.bf16.msra.mxu1 %v2630_v33 }
  0x27   :  { %2685 = vmatpush.bf16.msra.mxu3 %v2630_v33 }
  0x2a   :  { %1036 = vmatpush.bf16.msrb.mxu2 %v2643_v18  ;;  %v2652_v18 = vld [vmem:[%s3855_s7 + $0x30] sm:$0xff] }
  0x2b   :  { %1303 = vmatpush.bf16.msrb.mxu3 %v2653_v48 }
  0x2e   :  { %1037 = vmatpush.bf16.msrb.mxu2 %v2642_v25 }
  0x2f   :  { %1304 = vmatpush.bf16.msrb.mxu3 %v2652_v18 }
  0x31   :  { %381 = vmatmul.bf16.gmra.mxu0 %v2591_v11  ;;  %461 = vmatmul.bf16.gmra.mxu2 %v2607_v12 }
  0x32   :  { %1038 = vmatpush.bf16.msrb.mxu2 %v2641_v36 }
  0x36   :  { %1039 = vmatpush.bf16.msrb.mxu2 %v2640_v1 }
  0x41   :  { %386 = vmatmul.bf16.gmra.mxu0 %v2592_v14  ;;  %466 = vmatmul.bf16.gmra.mxu2 %v2608_v15 }
  0x51   :  { %391 = vmatmul.bf16.gmra.mxu0 %v2593_v16  ;;  %471 = vmatmul.bf16.gmra.mxu2 %v2609_v17 }
  0x61   :  { %396 = vmatmul.bf16.gmra.mxu0 %v2594_v19  ;;  %476 = vmatmul.bf16.gmra.mxu2 %v2610_v20 }
  0x71   :  { %401 = vmatmul.bf16.gmra.mxu0 %v2595_v22  ;;  %481 = vmatmul.bf16.gmra.mxu2 %v2611_v23  ;;  %v2601_v22 = vld [vmem:[%s3853_s0 + $0x58] sm:$0xff] }
  0x81   :  { %406 = vmatmul.bf16.gmra.mxu0 %v2596_v29  ;;  %486 = vmatmul.bf16.gmra.mxu2 %v2612_v30 }
  0x91   :  { %411 = vmatmul.bf16.gmra.mxu0 %v2597_v34  ;;  %491 = vmatmul.bf16.gmra.mxu2 %v2613_v35  ;;  %v2639_v35 = vld [vmem:[%s3852_s5 + $0x8] sm:$0xff] }
  0x92   :  { %1040 = vmatpush.bf16.msrb.mxu2 %v2639_v35 }
  0x9e   :  { %v377_v39 = vpop.f32.mrf.mxu0 }
  0x9f   :  { %v378_v42 = vadd.f32 %v3015_v40, %v377_v39  ;;  %v2602_v39 = vld [vmem:[%s3853_s0 + $0x60] sm:$0xff] }
  0xa1   :  { %416 = vmatmul.bf16.gmra.mxu0 %v2598_v37  ;;  %496 = vmatmul.bf16.gmra.mxu2 %v2614_v38  ;;  %v537_v45 = vmax.f32 %v378_v42, 0.0  ;;  %v2618_v42 = vld [vmem:[%s3853_s0 + $0xe0] sm:$0xff] }
  0xa4   :  { %v457_v41 = vpop.f32.mrf.mxu2 }
  0xa5   :  { %v458_v47 = vadd.f32 %v3015_v40, %v457_v41 }
  0xa6   :  { %v379_v43 = vpop.f32.mrf.mxu0 }
  0xa7   :  { %v380_v44 = vadd.f32 %v3015_v40, %v379_v43  ;;  %v569_v51 = vmax.f32 %v458_v47, 0.0 }
  0xa9   :  { %v538_v46 = vmax.f32 %v380_v44, 0.0 }
  0xab   :  { %v601_v49 = vpack.c.bf16 %v538_v46, %v537_v45 }
  0xac   :  { %v459_v50 = vpop.f32.mrf.mxu2 }
  0xad   :  { %709 = vmatmul.bf16.vlgmr.msra.gmra.mxu1 %v601_v49  ;;  %v460_v53 = vadd.f32 %v3015_v40, %v459_v50 }
  0xae   :  { %v382_v55 = vpop.f32.mrf.mxu0 }
  0xaf   :  { %v570_v56 = vmax.f32 %v460_v53, 0.0  ;;  %v383_v59 = vadd.f32 %v3015_v40, %v382_v55  ;;  %v2651_v53 = vld [vmem:[%s3855_s7 + $0x28] sm:$0xff] }
  0xb0   :  { %1305 = vmatpush.bf16.msrb.mxu3 %v2651_v53 }
  0xb1   :  { %421 = vmatmul.bf16.gmra.mxu0 %v2599_v52  ;;  %501 = vmatmul.bf16.gmra.mxu2 %v2615_v54  ;;  %v617_v57 = vpack.c.bf16 %v570_v56, %v569_v51  ;;  %v539_v62 = vmax.f32 %v383_v59, 0.0  ;;  %v2619_v59 = vld [vmem:[%s3853_s0 + $0xe8] sm:$0xff] }
  0xb3   :  { %789 = vmatmul.bf16.vlgmr.msra.gmra.mxu3 %v617_v57  ;;  %v2603_v57 = vld [vmem:[%s3853_s0 + $0x68] sm:$0xff] }
  0xb4   :  { %v462_v58 = vpop.f32.mrf.mxu2 }
  0xb5   :  { %v463_v0 = vadd.f32 %v3015_v40, %v462_v58 }
  0xb6   :  { %v384_v60 = vpop.f32.mrf.mxu0 }
  0xb7   :  { %v385_v61 = vadd.f32 %v3015_v40, %v384_v60  ;;  %v571_v4 = vmax.f32 %v463_v0, 0.0 }
  0xb9   :  { %v540_v63 = vmax.f32 %v385_v61, 0.0 }
  0xbb   :  { %v602_v2 = vpack.c.bf16 %v540_v63, %v539_v62 }
  0xbc   :  { %v464_v3 = vpop.f32.mrf.mxu2 }
  0xbd   :  { %714 = vmatmul.bf16.gmra.mxu1 %v602_v2  ;;  %v465_v6 = vadd.f32 %v3015_v40, %v464_v3 }
  0xbe   :  { %v387_v8 = vpop.f32.mrf.mxu0 }
  0xbf   :  { %v572_v9 = vmax.f32 %v465_v6, 0.0  ;;  %v388_v12 = vadd.f32 %v3015_v40, %v387_v8  ;;  %v2638_v6 = vld [vmem:[%s3852_s5] sm:$0xff] }
  0xc0   :  { %1041 = vmatpush.bf16.msrb.mxu2 %v2638_v6 }
  0xc1   :  { %426 = vmatmul.bf16.gmra.mxu0 %v2600_v5  ;;  %506 = vmatmul.bf16.gmra.mxu2 %v2616_v7  ;;  %v618_v10 = vpack.c.bf16 %v572_v9, %v571_v4  ;;  %v541_v15 = vmax.f32 %v388_v12, 0.0  ;;  %v2620_v12 = vld [vmem:[%s3853_s0 + $0xf0] sm:$0xff] }
  0xc3   :  { %794 = vmatmul.bf16.gmra.mxu3 %v618_v10  ;;  %v2604_v10 = vld [vmem:[%s3853_s0 + $0x70] sm:$0xff] }
  0xc4   :  { %v467_v11 = vpop.f32.mrf.mxu2 }
  0xc5   :  { %v468_v17 = vadd.f32 %v3015_v40, %v467_v11 }
  0xc6   :  { %v389_v13 = vpop.f32.mrf.mxu0 }
  0xc7   :  { %v390_v14 = vadd.f32 %v3015_v40, %v389_v13  ;;  %v573_v21 = vmax.f32 %v468_v17, 0.0 }
  0xc9   :  { %v542_v16 = vmax.f32 %v390_v14, 0.0 }
  0xcb   :  { %v603_v19 = vpack.c.bf16 %v542_v16, %v541_v15 }
  0xcc   :  { %v469_v20 = vpop.f32.mrf.mxu2 }
  0xcd   :  { %719 = vmatmul.bf16.gmra.mxu1 %v603_v19  ;;  %v470_v23 = vadd.f32 %v3015_v40, %v469_v20 }
  0xce   :  { %v392_v25 = vpop.f32.mrf.mxu0 }
  0xcf   :  { %v574_v26 = vmax.f32 %v470_v23, 0.0  ;;  %v393_v29 = vadd.f32 %v3015_v40, %v392_v25  ;;  %v2650_v23 = vld [vmem:[%s3855_s7 + $0x20] sm:$0xff] }
  0xd0   :  { %1306 = vmatpush.bf16.msrb.mxu3 %v2650_v23 }
  0xd1   :  { %431 = vmatmul.bf16.gmra.mxu0 %v2601_v22  ;;  %511 = vmatmul.bf16.gmra.mxu2 %v2617_v24  ;;  %v619_v27 = vpack.c.bf16 %v574_v26, %v573_v21  ;;  %v543_v32 = vmax.f32 %v393_v29, 0.0  ;;  %v2621_v29 = vld [vmem:[%s3853_s0 + $0xf8] sm:$0xff] }
  0xd3   :  { %799 = vmatmul.bf16.gmra.mxu3 %v619_v27  ;;  %v2605_v27 = vld [vmem:[%s3853_s0 + $0x78] sm:$0xff] }
  0xd4   :  { %v472_v28 = vpop.f32.mrf.mxu2 }
  0xd5   :  { %v473_v34 = vadd.f32 %v3015_v40, %v472_v28 }
  0xd6   :  { %v394_v30 = vpop.f32.mrf.mxu0 }
  0xd7   :  { %v395_v31 = vadd.f32 %v3015_v40, %v394_v30  ;;  %v575_v38 = vmax.f32 %v473_v34, 0.0 }
  0xd9   :  { %v544_v33 = vmax.f32 %v395_v31, 0.0 }
  0xdb   :  { %v604_v36 = vpack.c.bf16 %v544_v33, %v543_v32 }
  0xdc   :  { %v474_v37 = vpop.f32.mrf.mxu2 }
  0xdd   :  { %724 = vmatmul.bf16.gmra.mxu1 %v604_v36  ;;  %v475_v41 = vadd.f32 %v3015_v40, %v474_v37 }
  0xde   :  { %v397_v43 = vpop.f32.mrf.mxu0 }
  0xdf   :  { %v576_v44 = vmax.f32 %v475_v41, 0.0  ;;  %v398_v47 = vadd.f32 %v3015_v40, %v397_v43 }
  0xe1   :  { %436 = vmatmul.bf16.gmra.mxu0 %v2602_v39  ;;  %516 = vmatmul.bf16.gmra.mxu2 %v2618_v42  ;;  %v620_v45 = vpack.c.bf16 %v576_v44, %v575_v38  ;;  %v545_v50 = vmax.f32 %v398_v47, 0.0 }
  0xe3   :  { %804 = vmatmul.bf16.gmra.mxu3 %v620_v45 }
  0xe4   :  { %v477_v46 = vpop.f32.mrf.mxu2 }
  0xe5   :  { %v478_v52 = vadd.f32 %v3015_v40, %v477_v46 }
  0xe6   :  { %v399_v48 = vpop.f32.mrf.mxu0 }
  0xe7   :  { %v400_v49 = vadd.f32 %v3015_v40, %v399_v48  ;;  %v577_v56 = vmax.f32 %v478_v52, 0.0 }
  0xe9   :  { %v546_v51 = vmax.f32 %v400_v49, 0.0 }
  0xeb   :  { %v605_v54 = vpack.c.bf16 %v546_v51, %v545_v50 }
  0xec   :  { %v479_v55 = vpop.f32.mrf.mxu2 }
  0xed   :  { %729 = vmatmul.bf16.gmra.mxu1 %v605_v54  ;;  %v480_v58 = vadd.f32 %v3015_v40, %v479_v55  ;;  %v2649_v55 = vld [vmem:[%s3855_s7 + $0x18] sm:$0xff] }
  0xee   :  { %v402_v60 = vpop.f32.mrf.mxu0  ;;  %1307 = vmatpush.bf16.msrb.mxu3 %v2649_v55 }
  0xef   :  { %v578_v61 = vmax.f32 %v480_v58, 0.0  ;;  %v403_v0 = vadd.f32 %v3015_v40, %v402_v60  ;;  %v3121_v60 = vld [vmem:[%s3856_s4] ss:$0 sm:$0xff] }
  0xf1   :  { %441 = vmatmul.bf16.gmra.mxu0 %v2603_v57  ;;  %521 = vmatmul.bf16.gmra.mxu2 %v2619_v59  ;;  %v621_v62 = vpack.c.bf16 %v578_v61, %v577_v56  ;;  %v547_v3 = vmax.f32 %v403_v0, 0.0 }
  0xf3   :  { %809 = vmatmul.bf16.gmra.mxu3 %v621_v62 }
  0xf4   :  { %v482_v63 = vpop.f32.mrf.mxu2 }
  0xf5   :  { %v483_v5 = vadd.f32 %v3015_v40, %v482_v63 }
  0xf6   :  { %v404_v1 = vpop.f32.mrf.mxu0 }
  0xf7   :  { %v405_v2 = vadd.f32 %v3015_v40, %v404_v1  ;;  %v579_v9 = vmax.f32 %v483_v5, 0.0 }
  0xf9   :  { %v548_v4 = vmax.f32 %v405_v2, 0.0 }
  0xfb   :  { %v606_v7 = vpack.c.bf16 %v548_v4, %v547_v3 }
  0xfc   :  { %v484_v8 = vpop.f32.mrf.mxu2 }
  0xfd   :  { %734 = vmatmul.bf16.gmra.mxu1 %v606_v7  ;;  %v485_v11 = vadd.f32 %v3015_v40, %v484_v8 }
  0xfe   :  { %v407_v13 = vpop.f32.mrf.mxu0 }
  0xff   :  { %v580_v14 = vmax.f32 %v485_v11, 0.0  ;;  %v408_v17 = vadd.f32 %v3015_v40, %v407_v13 }
 0x101   :  { %446 = vmatmul.bf16.gmra.mxu0 %v2604_v10  ;;  %526 = vmatmul.bf16.gmra.mxu2 %v2620_v12  ;;  %v622_v15 = vpack.c.bf16 %v580_v14, %v579_v9  ;;  %v549_v20 = vmax.f32 %v408_v17, 0.0 }
 0x103   :  { %814 = vmatmul.bf16.gmra.mxu3 %v622_v15 }
 0x104   :  { %v487_v16 = vpop.f32.mrf.mxu2 }
 0x105   :  { %v488_v22 = vadd.f32 %v3015_v40, %v487_v16 }
 0x106   :  { %v409_v18 = vpop.f32.mrf.mxu0 }
 0x107   :  { %v410_v19 = vadd.f32 %v3015_v40, %v409_v18  ;;  %v581_v26 = vmax.f32 %v488_v22, 0.0 }
 0x109   :  { %v550_v21 = vmax.f32 %v410_v19, 0.0 }
 0x10b   :  { %v607_v24 = vpack.c.bf16 %v550_v21, %v549_v20  ;;  %v2661_v21 = vld [vmem:[%s3857_s9 + $0x38] sm:$0xff] }
 0x10c   :  { %v489_v25 = vpop.f32.mrf.mxu2  ;;  %1636 = vmatpush.bf16.msrb.mxu0 %v2661_v21 }
 0x10d   :  { %739 = vmatmul.bf16.gmra.mxu1 %v607_v24  ;;  %v490_v28 = vadd.f32 %v3015_v40, %v489_v25 }
 0x10e   :  { %v412_v30 = vpop.f32.mrf.mxu0 }
 0x10f   :  { %v582_v31 = vmax.f32 %v490_v28, 0.0  ;;  %v413_v34 = vadd.f32 %v3015_v40, %v412_v30 }
 0x111   :  { %451 = vmatmul.bf16.gmra.mxu0 %v2605_v27  ;;  %531 = vmatmul.bf16.gmra.mxu2 %v2621_v29  ;;  %v623_v32 = vpack.c.bf16 %v582_v31, %v581_v26  ;;  %v551_v37 = vmax.f32 %v413_v34, 0.0 }
 0x113   :  { %819 = vmatmul.bf16.gmra.mxu3 %v623_v32 }
 0x114   :  { %v492_v33 = vpop.f32.mrf.mxu2 }
 0x115   :  { %v493_v39 = vadd.f32 %v3015_v40, %v492_v33 }
 0x116   :  { %v414_v35 = vpop.f32.mrf.mxu0 }
 0x117   :  { %v415_v36 = vadd.f32 %v3015_v40, %v414_v35  ;;  %v583_v43 = vmax.f32 %v493_v39, 0.0 }
 0x119   :  { %v552_v38 = vmax.f32 %v415_v36, 0.0 }
 0x11b   :  { %v608_v41 = vpack.c.bf16 %v552_v38, %v551_v37 }
 0x11c   :  { %v494_v42 = vpop.f32.mrf.mxu2 }
 0x11d   :  { %744 = vmatmul.bf16.gmra.mxu1 %v608_v41  ;;  %v495_v44 = vadd.f32 %v3015_v40, %v494_v42 }
 0x11e   :  { %v417_v45 = vpop.f32.mrf.mxu0 }
 0x11f   :  { %v584_v46 = vmax.f32 %v495_v44, 0.0  ;;  %v418_v49 = vadd.f32 %v3015_v40, %v417_v45  ;;  %v2648_v45 = vld [vmem:[%s3855_s7 + $0x10] sm:$0xff] }
 0x120   :  { %1308 = vmatpush.bf16.msrb.mxu3 %v2648_v45 }
 0x121   :  { %v624_v47 = vpack.c.bf16 %v584_v46, %v583_v43  ;;  %v553_v52 = vmax.f32 %v418_v49, 0.0 }
 0x123   :  { %824 = vmatmul.bf16.gmra.mxu3 %v624_v47 }
 0x124   :  { %v497_v48 = vpop.f32.mrf.mxu2 }
 0x125   :  { %v498_v54 = vadd.f32 %v3015_v40, %v497_v48 }
 0x126   :  { %v419_v50 = vpop.f32.mrf.mxu0 }
 0x127   :  { %v420_v51 = vadd.f32 %v3015_v40, %v419_v50  ;;  %v585_v59 = vmax.f32 %v498_v54, 0.0 }
 0x129   :  { %v554_v53 = vmax.f32 %v420_v51, 0.0 }
 0x12a   :  { %v710_v56 = vpop.f32.mrf.mxu1 }
 0x12b   :  { %v609_v57 = vpack.c.bf16 %v554_v53, %v553_v52  ;;  %v711_v0 = vadd.f32 %v3121_v60, %v710_v56 }
 0x12c   :  { %v499_v58 = vpop.f32.mrf.mxu2 }
 0x12d   :  { %749 = vmatmul.bf16.gmra.mxu1 %v609_v57  ;;  %v500_v61 = vadd.f32 %v3015_v40, %v499_v58  ;;  %v870_v5 = vmax.f32 %v711_v0, 0.0 }
 0x12e   :  { %v422_v62 = vpop.f32.mrf.mxu0 }
 0x12f   :  { %v586_v63 = vmax.f32 %v500_v61, 0.0  ;;  %v423_v6 = vadd.f32 %v3015_v40, %v422_v62 }
 0x131   :  { %v625_v1 = vpack.c.bf16 %v586_v63, %v585_v59  ;;  %v555_v12 = vmax.f32 %v423_v6, 0.0 }
 0x132   :  { %v712_v2 = vpop.f32.mrf.mxu1 }
 0x133   :  { %v713_v3 = vadd.f32 %v3121_v60, %v712_v2  ;;  %829 = vmatmul.bf16.gmra.mxu3 %v625_v1 }
 0x134   :  { %v502_v4 = vpop.f32.mrf.mxu2 }
 0x135   :  { %v871_v7 = vmax.f32 %v713_v3, 0.0  ;;  %v503_v14 = vadd.f32 %v3015_v40, %v502_v4 }
 0x136   :  { %v424_v8 = vpop.f32.mrf.mxu0  ;;  %v790_v9 = vpop.f32.mrf.mxu3 }
 0x137   :  { %v934_v10 = vpack.c.bf16 %v871_v7, %v870_v5  ;;  %v425_v11 = vadd.f32 %v3015_v40, %v424_v8  ;;  %v791_v16 = vadd.f32 %v3121_v60, %v790_v9  ;;  %v587_v19 = vmax.f32 %v503_v14, 0.0 }
 0x139   :  { %v556_v13 = vmax.f32 %v425_v11, 0.0  ;;  %1042 = vmatmul.bf16.vlgmr.msrb.gmra.mxu2 %v934_v10  ;;  %v902_v24 = vmax.f32 %v791_v16, 0.0 }
 0x13a   :  { %v715_v15 = vpop.f32.mrf.mxu1 }
 0x13b   :  { %v610_v17 = vpack.c.bf16 %v556_v13, %v555_v12  ;;  %v716_v27 = vadd.f32 %v3121_v60, %v715_v15 }
 0x13c   :  { %v504_v18 = vpop.f32.mrf.mxu2 }
 0x13d   :  { %754 = vmatmul.bf16.gmra.mxu1 %v610_v17  ;;  %v505_v20 = vadd.f32 %v3015_v40, %v504_v18  ;;  %v872_v34 = vmax.f32 %v716_v27, 0.0  ;;  %v2660_v17 = vld [vmem:[%s3857_s9 + $0x30] sm:$0xff] }
 0x13e   :  { %v427_v22 = vpop.f32.mrf.mxu0  ;;  %v792_v23 = vpop.f32.mrf.mxu3  ;;  %1637 = vmatpush.bf16.msrb.mxu0 %v2660_v17 }
 0x13f   :  { %v588_v25 = vmax.f32 %v505_v20, 0.0  ;;  %v793_v26 = vadd.f32 %v3121_v60, %v792_v23  ;;  %v428_v35 = vadd.f32 %v3015_v40, %v427_v22 }
 0x141   :  { %v903_v28 = vmax.f32 %v793_v26, 0.0  ;;  %v626_v29 = vpack.c.bf16 %v588_v25, %v587_v19  ;;  %v557_v42 = vmax.f32 %v428_v35, 0.0 }
 0x142   :  { %v717_v30 = vpop.f32.mrf.mxu1 }
 0x143   :  { %v718_v31 = vadd.f32 %v3121_v60, %v717_v30  ;;  %834 = vmatmul.bf16.gmra.mxu3 %v626_v29  ;;  %v3137_v32 = vpack.c.bf16 %v903_v28, %v902_v24 }
 0x144   :  { %v507_v33 = vpop.f32.mrf.mxu2 }
 0x145   :  { %v873_v36 = vmax.f32 %v718_v31, 0.0  ;;  %v508_v44 = vadd.f32 %v3015_v40, %v507_v33 }
 0x146   :  { %v429_v37 = vpop.f32.mrf.mxu0  ;;  %v795_v38 = vpop.f32.mrf.mxu3 }
 0x147   :  { %v430_v39 = vadd.f32 %v3015_v40, %v429_v37  ;;  %v935_v41 = vpack.c.bf16 %v873_v36, %v872_v34  ;;  %v796_v47 = vadd.f32 %v3121_v60, %v795_v38  ;;  %v589_v50 = vmax.f32 %v508_v44, 0.0 }
 0x149   :  { %v558_v43 = vmax.f32 %v430_v39, 0.0  ;;  %1047 = vmatmul.bf16.gmra.mxu2 %v935_v41  ;;  %v904_v54 = vmax.f32 %v796_v47, 0.0 }
 0x14a   :  { %v720_v46 = vpop.f32.mrf.mxu1 }
 0x14b   :  { %v611_v48 = vpack.c.bf16 %v558_v43, %v557_v42  ;;  %v721_v57 = vadd.f32 %v3121_v60, %v720_v46  ;;  %v2647_v42 = vld [vmem:[%s3855_s7 + $0x8] sm:$0xff] }
 0x14c   :  { %v509_v49 = vpop.f32.mrf.mxu2  ;;  %1309 = vmatpush.bf16.msrb.mxu3 %v2647_v42 }
 0x14d   :  { %759 = vmatmul.bf16.gmra.mxu1 %v611_v48  ;;  %v510_v51 = vadd.f32 %v3015_v40, %v509_v49  ;;  %v874_v1 = vmax.f32 %v721_v57, 0.0 }
 0x14e   :  { %v432_v52 = vpop.f32.mrf.mxu0  ;;  %v797_v53 = vpop.f32.mrf.mxu3 }
 0x14f   :  { %v590_v55 = vmax.f32 %v510_v51, 0.0  ;;  %v798_v56 = vadd.f32 %v3121_v60, %v797_v53  ;;  %v433_v2 = vadd.f32 %v3015_v40, %v432_v52 }
 0x151   :  { %v905_v58 = vmax.f32 %v798_v56, 0.0  ;;  %v627_v59 = vpack.c.bf16 %v590_v55, %v589_v50  ;;  %v559_v8 = vmax.f32 %v433_v2, 0.0 }
 0x152   :  { %v722_v61 = vpop.f32.mrf.mxu1 }
 0x153   :  { %v723_v62 = vadd.f32 %v3121_v60, %v722_v61  ;;  %839 = vmatmul.bf16.gmra.mxu3 %v627_v59  ;;  %v3150_v63 = vpack.c.bf16 %v905_v58, %v904_v54 }
 0x154   :  { %v512_v0 = vpop.f32.mrf.mxu2 }
 0x155   :  { %v875_v3 = vmax.f32 %v723_v62, 0.0  ;;  %v513_v10 = vadd.f32 %v3015_v40, %v512_v0 }
 0x156   :  { %v434_v4 = vpop.f32.mrf.mxu0  ;;  %v800_v5 = vpop.f32.mrf.mxu3 }
 0x157   :  { %v435_v6 = vadd.f32 %v3015_v40, %v434_v4  ;;  %v936_v7 = vpack.c.bf16 %v875_v3, %v874_v1  ;;  %v801_v12 = vadd.f32 %v3121_v60, %v800_v5  ;;  %v591_v15 = vmax.f32 %v513_v10, 0.0 }
 0x159   :  { %v560_v9 = vmax.f32 %v435_v6, 0.0  ;;  %1052 = vmatmul.bf16.gmra.mxu2 %v936_v7  ;;  %v906_v20 = vmax.f32 %v801_v12, 0.0 }
 0x15a   :  { %v725_v11 = vpop.f32.mrf.mxu1 }
 0x15b   :  { %v612_v13 = vpack.c.bf16 %v560_v9, %v559_v8  ;;  %v726_v23 = vadd.f32 %v3121_v60, %v725_v11 }
 0x15c   :  { %v514_v14 = vpop.f32.mrf.mxu2 }
 0x15d   :  { %764 = vmatmul.bf16.gmra.mxu1 %v612_v13  ;;  %v515_v16 = vadd.f32 %v3015_v40, %v514_v14  ;;  %v876_v30 = vmax.f32 %v726_v23, 0.0  ;;  %v2659_v14 = vld [vmem:[%s3857_s9 + $0x28] sm:$0xff] }
 0x15e   :  { %v437_v18 = vpop.f32.mrf.mxu0  ;;  %v802_v19 = vpop.f32.mrf.mxu3  ;;  %1638 = vmatpush.bf16.msrb.mxu0 %v2659_v14 }
 0x15f   :  { %v592_v21 = vmax.f32 %v515_v16, 0.0  ;;  %v803_v22 = vadd.f32 %v3121_v60, %v802_v19  ;;  %v438_v31 = vadd.f32 %v3015_v40, %v437_v18 }
 0x161   :  { %v907_v24 = vmax.f32 %v803_v22, 0.0  ;;  %v628_v25 = vpack.c.bf16 %v592_v21, %v591_v15  ;;  %v561_v38 = vmax.f32 %v438_v31, 0.0 }
 0x162   :  { %v727_v26 = vpop.f32.mrf.mxu1 }
 0x163   :  { %v728_v27 = vadd.f32 %v3121_v60, %v727_v26  ;;  %844 = vmatmul.bf16.gmra.mxu3 %v628_v25  ;;  %v3163_v28 = vpack.c.bf16 %v907_v24, %v906_v20 }
 0x164   :  { %v517_v29 = vpop.f32.mrf.mxu2 }
 0x165   :  { %v877_v33 = vmax.f32 %v728_v27, 0.0  ;;  %v518_v41 = vadd.f32 %v3015_v40, %v517_v29 }
 0x166   :  { %v439_v34 = vpop.f32.mrf.mxu0  ;;  %v805_v35 = vpop.f32.mrf.mxu3 }
 0x167   :  { %v440_v36 = vadd.f32 %v3015_v40, %v439_v34  ;;  %v937_v37 = vpack.c.bf16 %v877_v33, %v876_v30  ;;  %v806_v44 = vadd.f32 %v3121_v60, %v805_v35  ;;  %v593_v47 = vmax.f32 %v518_v41, 0.0  ;;  %v2646_v35 = vld [vmem:[%s3855_s7] sm:$0xff] }
 0x168   :  { %1310 = vmatpush.bf16.msrb.mxu3 %v2646_v35 }
 0x169   :  { %v562_v39 = vmax.f32 %v440_v36, 0.0  ;;  %1057 = vmatmul.bf16.gmra.mxu2 %v937_v37  ;;  %v908_v51 = vmax.f32 %v806_v44, 0.0 }
 0x16a   :  { %v730_v43 = vpop.f32.mrf.mxu1 }
 0x16b   :  { %v613_v45 = vpack.c.bf16 %v562_v39, %v561_v38  ;;  %v731_v54 = vadd.f32 %v3121_v60, %v730_v43 }
 0x16c   :  { %v519_v46 = vpop.f32.mrf.mxu2 }
 0x16d   :  { %769 = vmatmul.bf16.gmra.mxu1 %v613_v45  ;;  %v520_v48 = vadd.f32 %v3015_v40, %v519_v46  ;;  %v878_v62 = vmax.f32 %v731_v54, 0.0 }
 0x16e   :  { %v442_v49 = vpop.f32.mrf.mxu0  ;;  %v807_v50 = vpop.f32.mrf.mxu3 }
 0x16f   :  { %v594_v52 = vmax.f32 %v520_v48, 0.0  ;;  %v808_v53 = vadd.f32 %v3121_v60, %v807_v50  ;;  %v443_v0 = vadd.f32 %v3015_v40, %v442_v49 }
 0x171   :  { %v909_v55 = vmax.f32 %v808_v53, 0.0  ;;  %v629_v56 = vpack.c.bf16 %v594_v52, %v593_v47  ;;  %v563_v6 = vmax.f32 %v443_v0, 0.0 }
 0x172   :  { %v732_v57 = vpop.f32.mrf.mxu1 }
 0x173   :  { %v733_v58 = vadd.f32 %v3121_v60, %v732_v57  ;;  %849 = vmatmul.bf16.gmra.mxu3 %v629_v56  ;;  %v3176_v59 = vpack.c.bf16 %v909_v55, %v908_v51 }
 0x174   :  { %v522_v61 = vpop.f32.mrf.mxu2 }
 0x175   :  { %v879_v1 = vmax.f32 %v733_v58, 0.0  ;;  %v523_v8 = vadd.f32 %v3015_v40, %v522_v61 }
 0x176   :  { %v444_v2 = vpop.f32.mrf.mxu0  ;;  %v3179_v3 = vpop.f32.mrf.mxu3 }
 0x177   :  { %v445_v4 = vadd.f32 %v3015_v40, %v444_v2  ;;  %v938_v5 = vpack.c.bf16 %v879_v1, %v878_v62  ;;  %v595_v12 = vmax.f32 %v523_v8, 0.0 }
 0x179   :  { %v564_v7 = vmax.f32 %v445_v4, 0.0  ;;  %1062 = vmatmul.bf16.gmra.mxu2 %v938_v5  ;;  %v2658_v5 = vld [vmem:[%s3857_s9 + $0x20] sm:$0xff] }
 0x17a   :  { %v735_v9 = vpop.f32.mrf.mxu1  ;;  %1639 = vmatpush.bf16.msrb.mxu0 %v2658_v5 }
 0x17b   :  { %v614_v10 = vpack.c.bf16 %v564_v7, %v563_v6  ;;  %v736_v18 = vadd.f32 %v3121_v60, %v735_v9 }
 0x17c   :  { %v524_v11 = vpop.f32.mrf.mxu2 }
 0x17d   :  { %774 = vmatmul.bf16.gmra.mxu1 %v614_v10  ;;  %v525_v13 = vadd.f32 %v3015_v40, %v524_v11  ;;  %v880_v23 = vmax.f32 %v736_v18, 0.0 }
 0x17e   :  { %v447_v15 = vpop.f32.mrf.mxu0  ;;  %v3187_v16 = vpop.f32.mrf.mxu3 }
 0x17f   :  { %v596_v17 = vmax.f32 %v525_v13, 0.0  ;;  %v448_v24 = vadd.f32 %v3015_v40, %v447_v15 }
 0x181   :  { %v630_v19 = vpack.c.bf16 %v596_v17, %v595_v12  ;;  %v565_v31 = vmax.f32 %v448_v24, 0.0 }
 0x182   :  { %v737_v20 = vpop.f32.mrf.mxu1 }
 0x183   :  { %v738_v21 = vadd.f32 %v3121_v60, %v737_v20  ;;  %854 = vmatmul.bf16.gmra.mxu3 %v630_v19 }
 0x184   :  { %v527_v22 = vpop.f32.mrf.mxu2 }
 0x185   :  { %v881_v25 = vmax.f32 %v738_v21, 0.0  ;;  %v528_v34 = vadd.f32 %v3015_v40, %v527_v22 }
 0x186   :  { %v449_v26 = vpop.f32.mrf.mxu0  ;;  %v3192_v27 = vpop.f32.mrf.mxu3 }
 0x187   :  { %v450_v29 = vadd.f32 %v3015_v40, %v449_v26  ;;  %v939_v30 = vpack.c.bf16 %v881_v25, %v880_v23  ;;  %v597_v39 = vmax.f32 %v528_v34, 0.0 }
 0x189   :  { %v566_v33 = vmax.f32 %v450_v29, 0.0  ;;  %1067 = vmatmul.bf16.gmra.mxu2 %v939_v30  ;;  %v2657_v29 = vld [vmem:[%s3857_s9 + $0x18] sm:$0xff] }
 0x18a   :  { %v740_v36 = vpop.f32.mrf.mxu1  ;;  %1640 = vmatpush.bf16.msrb.mxu0 %v2657_v29 }
 0x18b   :  { %v615_v37 = vpack.c.bf16 %v566_v33, %v565_v31  ;;  %v741_v45 = vadd.f32 %v3121_v60, %v740_v36  ;;  %v3234_v33 = vld [vmem:[%s3858_s6] ss:$0 sm:$0xff] }
 0x18c   :  { %v529_v38 = vpop.f32.mrf.mxu2 }
 0x18d   :  { %779 = vmatmul.bf16.gmra.mxu1 %v615_v37  ;;  %v530_v41 = vadd.f32 %v3015_v40, %v529_v38  ;;  %v882_v50 = vmax.f32 %v741_v45, 0.0 }
 0x18e   :  { %v452_v42 = vpop.f32.mrf.mxu0  ;;  %v3200_v43 = vpop.f32.mrf.mxu3 }
 0x18f   :  { %v598_v44 = vmax.f32 %v530_v41, 0.0  ;;  %v453_v51 = vadd.f32 %v3015_v40, %v452_v42 }
 0x191   :  { %v631_v46 = vpack.c.bf16 %v598_v44, %v597_v39  ;;  %v567_v57 = vmax.f32 %v453_v51, 0.0 }
 0x192   :  { %v742_v47 = vpop.f32.mrf.mxu1 }
 0x193   :  { %v743_v48 = vadd.f32 %v3121_v60, %v742_v47  ;;  %859 = vmatmul.bf16.gmra.mxu3 %v631_v46  ;;  %v2669_v46 = vld [vmem:[%s3859_s11 + $0x38] sm:$0xff] }
 0x194   :  { %v532_v49 = vpop.f32.mrf.mxu2  ;;  %1969 = vmatpush.bf16.msrb.mxu1 %v2669_v46 }
 0x195   :  { %v883_v52 = vmax.f32 %v743_v48, 0.0  ;;  %v533_v61 = vadd.f32 %v3015_v40, %v532_v49 }
 0x196   :  { %v454_v53 = vpop.f32.mrf.mxu0  ;;  %v3205_v54 = vpop.f32.mrf.mxu3 }
 0x197   :  { %v455_v55 = vadd.f32 %v3015_v40, %v454_v53  ;;  %v940_v56 = vpack.c.bf16 %v883_v52, %v882_v50  ;;  %v599_v2 = vmax.f32 %v533_v61, 0.0 }
 0x199   :  { %v568_v58 = vmax.f32 %v455_v55, 0.0  ;;  %1072 = vmatmul.bf16.gmra.mxu2 %v940_v56 }
 0x19a   :  { %v745_v62 = vpop.f32.mrf.mxu1 }
 0x19b   :  { %v616_v0 = vpack.c.bf16 %v568_v58, %v567_v57  ;;  %v746_v8 = vadd.f32 %v3121_v60, %v745_v62 }
 0x19c   :  { %v534_v1 = vpop.f32.mrf.mxu2 }
 0x19d   :  { %784 = vmatmul.bf16.gmra.mxu1 %v616_v0  ;;  %v535_v4 = vadd.f32 %v3015_v40, %v534_v1  ;;  %v884_v12 = vmax.f32 %v746_v8, 0.0 }
 0x19e   :  { %v3213_v6 = vpop.f32.mrf.mxu3 }
 0x19f   :  { %v600_v7 = vmax.f32 %v535_v4, 0.0  ;;  %v2656_v4 = vld [vmem:[%s3857_s9 + $0x10] sm:$0xff] }
 0x1a0   :  { %1641 = vmatpush.bf16.msrb.mxu0 %v2656_v4 }
 0x1a1   :  { %v632_v9 = vpack.c.bf16 %v600_v7, %v599_v2 }
 0x1a2   :  { %v747_v10 = vpop.f32.mrf.mxu1 }
 0x1a3   :  { %v748_v11 = vadd.f32 %v3121_v60, %v747_v10  ;;  %864 = vmatmul.bf16.gmra.mxu3 %v632_v9 }
 0x1a5   :  { %v885_v13 = vmax.f32 %v748_v11, 0.0 }
 0x1a6   :  { %v3217_v14 = vpop.f32.mrf.mxu3 }
 0x1a7   :  { %v941_v40 = vpack.c.bf16 %v885_v13, %v884_v12 }
 0x1a9   :  { %1077 = vmatmul.bf16.gmra.mxu2 %v941_v40 }
 0x1aa   :  { %v750_v15 = vpop.f32.mrf.mxu1 }
 0x1ab   :  { %v751_v18 = vadd.f32 %v3121_v60, %v750_v15 }
 0x1ad   :  { %v886_v21 = vmax.f32 %v751_v18, 0.0 }
 0x1ae   :  { %v3219_v17 = vpop.f32.mrf.mxu3 }
 0x1b2   :  { %v752_v19 = vpop.f32.mrf.mxu1 }
 0x1b3   :  { %v753_v20 = vadd.f32 %v3121_v60, %v752_v19  ;;  %v2668_v19 = vld [vmem:[%s3859_s11 + $0x30] sm:$0xff] }
 0x1b4   :  { %1970 = vmatpush.bf16.msrb.mxu1 %v2668_v19  ;;  %v2654_v19 = vld [vmem:[%s3857_s9] sm:$0xff] }
 0x1b5   :  { %v887_v22 = vmax.f32 %v753_v20, 0.0 }
 0x1b6   :  { %v3223_v23 = vpop.f32.mrf.mxu3 }
 0x1b7   :  { %v942_v24 = vpack.c.bf16 %v887_v22, %v886_v21 }
 0x1b9   :  { %1082 = vmatmul.bf16.gmra.mxu2 %v942_v24 }
 0x1ba   :  { %v755_v25 = vpop.f32.mrf.mxu1 }
 0x1bb   :  { %v756_v31 = vadd.f32 %v3121_v60, %v755_v25 }
 0x1bc   :  { %v1043_v26 = vpop.f32.mrf.mxu2 }
 0x1bd   :  { %v888_v37 = vmax.f32 %v756_v31, 0.0  ;;  %v1044_v38 = vadd.f32 %v3234_v33, %v1043_v26 }
 0x1be   :  { %v3228_v30 = vpop.f32.mrf.mxu3 }
 0x1c2   :  { %v757_v34 = vpop.f32.mrf.mxu1 }
 0x1c3   :  { %v758_v35 = vadd.f32 %v3121_v60, %v757_v34 }
 0x1c4   :  { %v1045_v36 = vpop.f32.mrf.mxu2 }
 0x1c5   :  { %v889_v39 = vmax.f32 %v758_v35, 0.0  ;;  %v1046_v41 = vadd.f32 %v3234_v33, %v1045_v36 }
 0x1c6   :  { %v3239_v42 = vpop.f32.mrf.mxu3 }
 0x1c7   :  { %v1203_v44 = vpack.c.bf16 %v1046_v41, %v1044_v38  ;;  %v943_v45 = vpack.c.bf16 %v889_v39, %v888_v37 }
 0x1c9   :  { %1087 = vmatmul.bf16.gmra.mxu2 %v943_v45  ;;  %1311 = vmatmul.bf16.vlgmr.msrb.gmra.mxu3 %v1203_v44  ;;  %v2655_v45 = vld [vmem:[%s3857_s9 + $0x8] sm:$0xff] }
 0x1ca   :  { %v760_v47 = vpop.f32.mrf.mxu1  ;;  %1642 = vmatpush.bf16.msrb.mxu0 %v2655_v45  ;;  %v2666_v45 = vld [vmem:[%s3859_s11 + $0x20] sm:$0xff] }
 0x1cb   :  { %v761_v50 = vadd.f32 %v3121_v60, %v760_v47 }
 0x1cc   :  { %v1048_v48 = vpop.f32.mrf.mxu2 }
 0x1cd   :  { %v890_v55 = vmax.f32 %v761_v50, 0.0  ;;  %v1049_v56 = vadd.f32 %v3234_v33, %v1048_v48 }
 0x1ce   :  { %v3244_v49 = vpop.f32.mrf.mxu3  ;;  %1643 = vmatpush.bf16.msrb.mxu0 %v2654_v19 }
 0x1d2   :  { %v762_v51 = vpop.f32.mrf.mxu1 }
 0x1d3   :  { %v763_v52 = vadd.f32 %v3121_v60, %v762_v51 }
 0x1d4   :  { %v1050_v53 = vpop.f32.mrf.mxu2 }
 0x1d5   :  { %v891_v57 = vmax.f32 %v763_v52, 0.0  ;;  %v1051_v58 = vadd.f32 %v3234_v33, %v1050_v53 }
 0x1d6   :  { %v3250_v61 = vpop.f32.mrf.mxu3 }
 0x1d7   :  { %v1204_v62 = vpack.c.bf16 %v1051_v58, %v1049_v56  ;;  %v944_v0 = vpack.c.bf16 %v891_v57, %v890_v55 }
 0x1d9   :  { %1092 = vmatmul.bf16.gmra.mxu2 %v944_v0  ;;  %1316 = vmatmul.bf16.gmra.mxu3 %v1204_v62  ;;  %v2667_v62 = vld [vmem:[%s3859_s11 + $0x28] sm:$0xff] }
 0x1da   :  { %v765_v1 = vpop.f32.mrf.mxu1  ;;  %1971 = vmatpush.bf16.msrb.mxu1 %v2667_v62 }
 0x1db   :  { %v766_v7 = vadd.f32 %v3121_v60, %v765_v1 }
 0x1dc   :  { %v1053_v2 = vpop.f32.mrf.mxu2 }
 0x1dd   :  { %v892_v11 = vmax.f32 %v766_v7, 0.0  ;;  %v1054_v12 = vadd.f32 %v3234_v33, %v1053_v2 }
 0x1de   :  { %v3255_v5 = vpop.f32.mrf.mxu3  ;;  %1972 = vmatpush.bf16.msrb.mxu1 %v2666_v45 }
 0x1e2   :  { %v767_v8 = vpop.f32.mrf.mxu1 }
 0x1e3   :  { %v768_v9 = vadd.f32 %v3121_v60, %v767_v8 }
 0x1e4   :  { %v1055_v10 = vpop.f32.mrf.mxu2 }
 0x1e5   :  { %v893_v13 = vmax.f32 %v768_v9, 0.0  ;;  %v1056_v40 = vadd.f32 %v3234_v33, %v1055_v10 }
 0x1e6   :  { %v3264_v21 = vpop.f32.mrf.mxu3 }
 0x1e7   :  { %v1205_v15 = vpack.c.bf16 %v1056_v40, %v1054_v12  ;;  %v945_v18 = vpack.c.bf16 %v893_v13, %v892_v11 }
 0x1e9   :  { %1097 = vmatmul.bf16.gmra.mxu2 %v945_v18  ;;  %1321 = vmatmul.bf16.gmra.mxu3 %v1205_v15 }
 0x1ea   :  { %v770_v20 = vpop.f32.mrf.mxu1 }
 0x1eb   :  { %v771_v24 = vadd.f32 %v3121_v60, %v770_v20 }
 0x1ec   :  { %v1058_v22 = vpop.f32.mrf.mxu2 }
 0x1ed   :  { %v894_v34 = vmax.f32 %v771_v24, 0.0  ;;  %v1059_v35 = vadd.f32 %v3234_v33, %v1058_v22 }
 0x1ee   :  { %v3268_v29 = vpop.f32.mrf.mxu3 }
 0x1f2   :  { %v772_v25 = vpop.f32.mrf.mxu1 }
 0x1f3   :  { %v773_v26 = vadd.f32 %v3121_v60, %v772_v25 }
 0x1f4   :  { %v1060_v31 = vpop.f32.mrf.mxu2 }
 0x1f5   :  { %v895_v36 = vmax.f32 %v773_v26, 0.0  ;;  %v1061_v37 = vadd.f32 %v3234_v33, %v1060_v31 }
 0x1f6   :  { %v3275_v46 = vpop.f32.mrf.mxu3 }
 0x1f7   :  { %v1206_v38 = vpack.c.bf16 %v1061_v37, %v1059_v35  ;;  %v946_v39 = vpack.c.bf16 %v895_v36, %v894_v34 }
 0x1f9   :  { %1102 = vmatmul.bf16.gmra.mxu2 %v946_v39  ;;  %1326 = vmatmul.bf16.gmra.mxu3 %v1206_v38 }
 0x1fa   :  { %v775_v41 = vpop.f32.mrf.mxu1 }
 0x1fb   :  { %v776_v47 = vadd.f32 %v3121_v60, %v775_v41 }
 0x1fc   :  { %v1063_v44 = vpop.f32.mrf.mxu2 }
 0x1fd   :  { %v896_v52 = vmax.f32 %v776_v47, 0.0  ;;  %v1064_v53 = vadd.f32 %v3234_v33, %v1063_v44 }
 0x1fe   :  { %v3284_v0 = vpop.f32.mrf.mxu3 }
 0x202   :  { %v777_v48 = vpop.f32.mrf.mxu1 }
 0x203   :  { %v778_v50 = vadd.f32 %v3121_v60, %v777_v48 }
 0x204   :  { %v1065_v51 = vpop.f32.mrf.mxu2 }
 0x205   :  { %v897_v55 = vmax.f32 %v778_v50, 0.0  ;;  %v1066_v56 = vadd.f32 %v3234_v33, %v1065_v51 }
 0x206   :  { %v3287_v7 = vpop.f32.mrf.mxu3 }
 0x207   :  { %v1207_v57 = vpack.c.bf16 %v1066_v56, %v1064_v53  ;;  %v947_v58 = vpack.c.bf16 %v897_v55, %v896_v52 }
 0x209   :  { %1107 = vmatmul.bf16.gmra.mxu2 %v947_v58  ;;  %1331 = vmatmul.bf16.gmra.mxu3 %v1207_v57 }
 0x20a   :  { %v780_v1 = vpop.f32.mrf.mxu1 }
 0x20b   :  { %v781_v4 = vadd.f32 %v3121_v60, %v780_v1 }
 0x20c   :  { %v1068_v2 = vpop.f32.mrf.mxu2 }
 0x20d   :  { %v898_v11 = vmax.f32 %v781_v4, 0.0  ;;  %v1069_v12 = vadd.f32 %v3234_v33, %v1068_v2  ;;  %v2665_v4 = vld [vmem:[%s3859_s11 + $0x18] sm:$0xff] }
 0x20e   :  { %v3295_v22 = vpop.f32.mrf.mxu3  ;;  %1973 = vmatpush.bf16.msrb.mxu1 %v2665_v4 }
 0x212   :  { %v782_v8 = vpop.f32.mrf.mxu1 }
 0x213   :  { %v783_v9 = vadd.f32 %v3121_v60, %v782_v8 }
 0x214   :  { %v1070_v10 = vpop.f32.mrf.mxu2 }
 0x215   :  { %v899_v13 = vmax.f32 %v783_v9, 0.0  ;;  %v1071_v40 = vadd.f32 %v3234_v33, %v1070_v10  ;;  %v3324_v9 = vld [vmem:[%s3860_s8] ss:$0 sm:$0xff] }
 0x216   :  { %v3301_v39 = vpop.f32.mrf.mxu3 }
 0x217   :  { %v1208_v15 = vpack.c.bf16 %v1071_v40, %v1069_v12  ;;  %v948_v18 = vpack.c.bf16 %v899_v13, %v898_v11 }
 0x219   :  { %1112 = vmatmul.bf16.gmra.mxu2 %v948_v18  ;;  %1336 = vmatmul.bf16.gmra.mxu3 %v1208_v15 }
 0x21a   :  { %v785_v20 = vpop.f32.mrf.mxu1 }
 0x21b   :  { %v786_v25 = vadd.f32 %v3121_v60, %v785_v20 }
 0x21c   :  { %v1073_v24 = vpop.f32.mrf.mxu2 }
 0x21d   :  { %v900_v35 = vmax.f32 %v786_v25, 0.0  ;;  %v1074_v36 = vadd.f32 %v3234_v33, %v1073_v24 }
 0x21e   :  { %v3306_v48 = vpop.f32.mrf.mxu3 }
 0x222   :  { %v787_v26 = vpop.f32.mrf.mxu1 }
 0x223   :  { %v788_v31 = vadd.f32 %v3121_v60, %v787_v26 }
 0x224   :  { %v1075_v34 = vpop.f32.mrf.mxu2 }
 0x225   :  { %v901_v37 = vmax.f32 %v788_v31, 0.0  ;;  %v1076_v38 = vadd.f32 %v3234_v33, %v1075_v34 }
 0x226   :  { %v3311_v55 = vpop.f32.mrf.mxu3 }
 0x227   :  { %v1209_v41 = vpack.c.bf16 %v1076_v38, %v1074_v36  ;;  %v949_v44 = vpack.c.bf16 %v901_v37, %v900_v35 }
 0x229   :  { %1117 = vmatmul.bf16.gmra.mxu2 %v949_v44  ;;  %1341 = vmatmul.bf16.gmra.mxu3 %v1209_v41 }
 0x22c   :  { %v1078_v47 = vpop.f32.mrf.mxu2 }
 0x22d   :  { %v1079_v51 = vadd.f32 %v3234_v33, %v1078_v47 }
 0x22e   :  { %v3313_v57 = vpop.f32.mrf.mxu3 }
 0x234   :  { %v1080_v50 = vpop.f32.mrf.mxu2 }
 0x235   :  { %v1081_v52 = vadd.f32 %v3234_v33, %v1080_v50 }
 0x237   :  { %v1210_v53 = vpack.c.bf16 %v1081_v52, %v1079_v51  ;;  %v811_v51 = vadd.f32 %v3121_v60, %v3179_v3  ;;  %v813_v52 = vadd.f32 %v3121_v60, %v3187_v16 }
 0x239   :  { %1122 = vmatmul.bf16.gmra.mxu2 %v3137_v32  ;;  %1346 = vmatmul.bf16.gmra.mxu3 %v1210_v53  ;;  %v910_v53 = vmax.f32 %v811_v51, 0.0 }
 0x23c   :  { %v1083_v56 = vpop.f32.mrf.mxu2 }
 0x23d   :  { %v1084_v62 = vadd.f32 %v3234_v33, %v1083_v56  ;;  %v911_v56 = vmax.f32 %v813_v52, 0.0 }
 0x244   :  { %v1085_v58 = vpop.f32.mrf.mxu2 }
 0x245   :  { %v1086_v1 = vadd.f32 %v3234_v33, %v1085_v58 }
 0x247   :  { %v1211_v2 = vpack.c.bf16 %v1086_v1, %v1084_v62 }
 0x249   :  { %1127 = vmatmul.bf16.gmra.mxu2 %v3150_v63  ;;  %1351 = vmatmul.bf16.gmra.mxu3 %v1211_v2 }
 0x24c   :  { %v1088_v32 = vpop.f32.mrf.mxu2  ;;  %v1312_v8 = vpop.f32.mrf.mxu3 }
 0x24d   :  { %v1313_v10 = vadd.f32 %v3324_v9, %v1312_v8  ;;  %v1089_v13 = vadd.f32 %v3234_v33, %v1088_v32 }
 0x24f   :  { %v1472_v63 = vmax.f32 %v1313_v10, 0.0 }
 0x254   :  { %v1090_v11 = vpop.f32.mrf.mxu2  ;;  %v1314_v12 = vpop.f32.mrf.mxu3 }
 0x255   :  { %v1091_v40 = vadd.f32 %v3234_v33, %v1090_v11  ;;  %v1315_v15 = vadd.f32 %v3324_v9, %v1314_v12  ;;  %v954_v11 = vpack.c.bf16 %v911_v56, %v910_v53 }
 0x257   :  { %v1212_v18 = vpack.c.bf16 %v1091_v40, %v1089_v13  ;;  %v1473_v19 = vmax.f32 %v1315_v15, 0.0  ;;  %v816_v13 = vadd.f32 %v3121_v60, %v3192_v27  ;;  %v818_v40 = vadd.f32 %v3121_v60, %v3200_v43  ;;  %v2663_v27 = vld [vmem:[%s3859_s11 + $0x8] sm:$0xff] }
 0x259   :  { %v1536_v20 = vpack.c.bf16 %v1473_v19, %v1472_v63  ;;  %1132 = vmatmul.bf16.gmra.mxu2 %v3163_v28  ;;  %1356 = vmatmul.bf16.gmra.mxu3 %v1212_v18  ;;  %v2664_v28 = vld [vmem:[%s3859_s11 + $0x10] sm:$0xff]  ;;  %v912_v15 = vmax.f32 %v816_v13, 0.0  ;;  %v913_v63 = vmax.f32 %v818_v40, 0.0 }
 0x25a   :  { %1974 = vmatpush.bf16.msrb.mxu1 %v2664_v28 }
 0x25b   :  { %1644 = vmatmul.bf16.vlgmr.msrb.gmra.mxu0 %v1536_v20 }
 0x25c   :  { %v1093_v24 = vpop.f32.mrf.mxu2  ;;  %v1317_v25 = vpop.f32.mrf.mxu3 }
 0x25d   :  { %v1318_v26 = vadd.f32 %v3324_v9, %v1317_v25  ;;  %v1094_v35 = vadd.f32 %v3234_v33, %v1093_v24 }
 0x25e   :  { %1975 = vmatpush.bf16.msrb.mxu1 %v2663_v27 }
 0x25f   :  { %v1474_v38 = vmax.f32 %v1318_v26, 0.0 }
 0x264   :  { %v1095_v31 = vpop.f32.mrf.mxu2  ;;  %v1319_v34 = vpop.f32.mrf.mxu3 }
 0x265   :  { %v1096_v36 = vadd.f32 %v3234_v33, %v1095_v31  ;;  %v1320_v37 = vadd.f32 %v3324_v9, %v1319_v34 }
 0x267   :  { %v1213_v41 = vpack.c.bf16 %v1096_v36, %v1094_v35  ;;  %v1475_v44 = vmax.f32 %v1320_v37, 0.0  ;;  %v955_v36 = vpack.c.bf16 %v913_v63, %v912_v15 }
 0x269   :  { %1137 = vmatmul.bf16.gmra.mxu2 %v3176_v59  ;;  %1361 = vmatmul.bf16.gmra.mxu3 %v1213_v41  ;;  %v1537_v45 = vpack.c.bf16 %v1475_v44, %v1474_v38  ;;  %v821_v41 = vadd.f32 %v3121_v60, %v3205_v54  ;;  %v823_v44 = vadd.f32 %v3121_v60, %v3213_v6 }
 0x26b   :  { %1649 = vmatmul.bf16.gmra.mxu0 %v1537_v45  ;;  %v914_v28 = vmax.f32 %v821_v41, 0.0  ;;  %v915_v45 = vmax.f32 %v823_v44, 0.0 }
 0x26c   :  { %v1098_v47 = vpop.f32.mrf.mxu2  ;;  %v1322_v50 = vpop.f32.mrf.mxu3 }
 0x26d   :  { %v1323_v58 = vadd.f32 %v3324_v9, %v1322_v50  ;;  %v1099_v59 = vadd.f32 %v3234_v33, %v1098_v47 }
 0x26f   :  { %v1476_v32 = vmax.f32 %v1323_v58, 0.0 }
 0x274   :  { %v1100_v62 = vpop.f32.mrf.mxu2  ;;  %v1324_v1 = vpop.f32.mrf.mxu3 }
 0x275   :  { %v1101_v2 = vadd.f32 %v3234_v33, %v1100_v62  ;;  %v1325_v4 = vadd.f32 %v3324_v9, %v1324_v1 }
 0x277   :  { %v1214_v8 = vpack.c.bf16 %v1101_v2, %v1099_v59  ;;  %v1477_v10 = vmax.f32 %v1325_v4, 0.0  ;;  %v956_v59 = vpack.c.bf16 %v915_v45, %v914_v28  ;;  %v826_v4 = vadd.f32 %v3121_v60, %v3217_v14 }
 0x279   :  { %1142 = vmatmul.bf16.gmra.mxu2 %v954_v11  ;;  %1366 = vmatmul.bf16.gmra.mxu3 %v1214_v8  ;;  %v1538_v3 = vpack.c.bf16 %v1477_v10, %v1476_v32  ;;  %v828_v32 = vadd.f32 %v3121_v60, %v3219_v17  ;;  %v916_v8 = vmax.f32 %v826_v4, 0.0  ;;  %v2662_v60 = vld [vmem:[%s3859_s11] sm:$0xff] }
 0x27a   :  { %1976 = vmatpush.bf16.msrb.mxu1 %v2662_v60 }
 0x27b   :  { %1654 = vmatmul.bf16.gmra.mxu0 %v1538_v3  ;;  %v917_v10 = vmax.f32 %v828_v32, 0.0 }
 0x27c   :  { %v1103_v16 = vpop.f32.mrf.mxu2  ;;  %v1327_v12 = vpop.f32.mrf.mxu3 }
 0x27d   :  { %v1328_v18 = vadd.f32 %v3324_v9, %v1327_v12  ;;  %v1104_v24 = vadd.f32 %v3234_v33, %v1103_v16 }
 0x27f   :  { %v1478_v31 = vmax.f32 %v1328_v18, 0.0 }
 0x284   :  { %v1105_v19 = vpop.f32.mrf.mxu2  ;;  %v1329_v20 = vpop.f32.mrf.mxu3 }
 0x285   :  { %v1106_v25 = vadd.f32 %v3234_v33, %v1105_v19  ;;  %v1330_v26 = vadd.f32 %v3324_v9, %v1329_v20  ;;  %v957_v19 = vpack.c.bf16 %v917_v10, %v916_v8 }
 0x287   :  { %v1215_v34 = vpack.c.bf16 %v1106_v25, %v1104_v24  ;;  %v1479_v35 = vmax.f32 %v1330_v26, 0.0  ;;  %v3380_v24 = vld [vmem:[%s3856_s4] ss:$0 sm:$0xff] }
 0x288   :  { %v831_v25 = vadd.f32 %v3380_v24, %v3223_v23  ;;  %v833_v26 = vadd.f32 %v3380_v24, %v3228_v30  ;;  %v841_v10 = vadd.f32 %v3380_v24, %v3250_v61 }
 0x289   :  { %1147 = vmatmul.bf16.gmra.mxu2 %v955_v36  ;;  %1371 = vmatmul.bf16.gmra.mxu3 %v1215_v34  ;;  %v1539_v43 = vpack.c.bf16 %v1479_v35, %v1478_v31 }
 0x28a   :  { %v918_v31 = vmax.f32 %v831_v25, 0.0  ;;  %v919_v34 = vmax.f32 %v833_v26, 0.0 }
 0x28b   :  { %1659 = vmatmul.bf16.gmra.mxu0 %v1539_v43 }
 0x28c   :  { %v1108_v37 = vpop.f32.mrf.mxu2  ;;  %v1332_v38 = vpop.f32.mrf.mxu3  ;;  %v958_v45 = vpack.c.bf16 %v919_v34, %v918_v31  ;;  %v846_v31 = vadd.f32 %v3380_v24, %v3264_v21  ;;  %v848_v34 = vadd.f32 %v3380_v24, %v3268_v29 }
 0x28d   :  { %v1333_v47 = vadd.f32 %v3324_v9, %v1332_v38  ;;  %v1109_v52 = vadd.f32 %v3234_v33, %v1108_v37 }
 0x28f   :  { %v1480_v58 = vmax.f32 %v1333_v47, 0.0 }
 0x294   :  { %v1110_v50 = vpop.f32.mrf.mxu2  ;;  %v1334_v51 = vpop.f32.mrf.mxu3 }
 0x295   :  { %v1111_v53 = vadd.f32 %v3234_v33, %v1110_v50  ;;  %v1335_v56 = vadd.f32 %v3324_v9, %v1334_v51  ;;  %v836_v50 = vadd.f32 %v3380_v24, %v3239_v42  ;;  %v838_v51 = vadd.f32 %v3380_v24, %v3244_v49 }
 0x297   :  { %v1216_v62 = vpack.c.bf16 %v1111_v53, %v1109_v52  ;;  %v1481_v1 = vmax.f32 %v1335_v56, 0.0  ;;  %v920_v52 = vmax.f32 %v836_v50, 0.0  ;;  %v921_v53 = vmax.f32 %v838_v51, 0.0 }
 0x299   :  { %1152 = vmatmul.bf16.gmra.mxu2 %v956_v59  ;;  %1376 = vmatmul.bf16.gmra.mxu3 %v1216_v62  ;;  %v1540_v54 = vpack.c.bf16 %v1481_v1, %v1480_v58  ;;  %v959_v32 = vpack.c.bf16 %v921_v53, %v920_v52 }
 0x29b   :  { %1664 = vmatmul.bf16.gmra.mxu0 %v1540_v54 }
 0x29c   :  { %v1113_v6 = vpop.f32.mrf.mxu2  ;;  %v1337_v2 = vpop.f32.mrf.mxu3 }
 0x29d   :  { %v1338_v11 = vadd.f32 %v3324_v9, %v1337_v2  ;;  %v1114_v12 = vadd.f32 %v3234_v33, %v1113_v6 }
 0x29f   :  { %v1482_v15 = vmax.f32 %v1338_v11, 0.0  ;;  %v843_v11 = vadd.f32 %v3380_v24, %v3255_v5 }
 0x2a4   :  { %v1115_v3 = vpop.f32.mrf.mxu2  ;;  %v1339_v16 = vpop.f32.mrf.mxu3 }
 0x2a5   :  { %v1116_v13 = vadd.f32 %v3234_v33, %v1115_v3  ;;  %v1340_v40 = vadd.f32 %v3324_v9, %v1339_v16  ;;  %v922_v3 = vmax.f32 %v841_v10, 0.0  ;;  %v923_v16 = vmax.f32 %v843_v11, 0.0 }
 0x2a7   :  { %v1217_v63 = vpack.c.bf16 %v1116_v13, %v1114_v12  ;;  %v1483_v18 = vmax.f32 %v1340_v40, 0.0 }
 0x2a9   :  { %1157 = vmatmul.bf16.gmra.mxu2 %v957_v19  ;;  %1381 = vmatmul.bf16.gmra.mxu3 %v1217_v63  ;;  %v1541_v14 = vpack.c.bf16 %v1483_v18, %v1482_v15 }
 0x2ab   :  { %1669 = vmatmul.bf16.gmra.mxu0 %v1541_v14 }
 0x2ac   :  { %v1118_v17 = vpop.f32.mrf.mxu2  ;;  %v1342_v20 = vpop.f32.mrf.mxu3 }
 0x2ad   :  { %v1343_v35 = vadd.f32 %v3324_v9, %v1342_v20  ;;  %v1119_v43 = vadd.f32 %v3234_v33, %v1118_v17  ;;  %v960_v17 = vpack.c.bf16 %v923_v16, %v922_v3  ;;  %v3409_v20 = vld [vmem:[%s3861_s10] ss:$0 sm:$0xff] }
 0x2af   :  { %v1484_v41 = vmax.f32 %v1343_v35, 0.0 }
 0x2b4   :  { %v1120_v36 = vpop.f32.mrf.mxu2  ;;  %v1344_v27 = vpop.f32.mrf.mxu3 }
 0x2b5   :  { %v1121_v37 = vadd.f32 %v3234_v33, %v1120_v36  ;;  %v1345_v38 = vadd.f32 %v3324_v9, %v1344_v27 }
 0x2b7   :  { %v1218_v44 = vpack.c.bf16 %v1121_v37, %v1119_v43  ;;  %v1485_v28 = vmax.f32 %v1345_v38, 0.0  ;;  %v924_v43 = vmax.f32 %v846_v31, 0.0  ;;  %v925_v37 = vmax.f32 %v848_v34, 0.0 }
 0x2b9   :  { %1162 = vmatmul.bf16.gmra.mxu2 %v958_v45  ;;  %1386 = vmatmul.bf16.gmra.mxu3 %v1218_v44  ;;  %v1542_v23 = vpack.c.bf16 %v1485_v28, %v1484_v41  ;;  %v961_v52 = vpack.c.bf16 %v925_v37, %v924_v43 }
 0x2bb   :  { %1674 = vmatmul.bf16.gmra.mxu0 %v1542_v23 }
 0x2bc   :  { %v1123_v30 = vpop.f32.mrf.mxu2  ;;  %v1347_v47 = vpop.f32.mrf.mxu3 }
 0x2bd   :  { %v1348_v56 = vadd.f32 %v3324_v9, %v1347_v47  ;;  %v1124_v1 = vadd.f32 %v3234_v33, %v1123_v30 }
 0x2bf   :  { %v1486_v6 = vmax.f32 %v1348_v56, 0.0 }
 0x2c4   :  { %v1125_v58 = vpop.f32.mrf.mxu2  ;;  %v1349_v62 = vpop.f32.mrf.mxu3 }
 0x2c5   :  { %v1126_v59 = vadd.f32 %v3234_v33, %v1125_v58  ;;  %v1350_v54 = vadd.f32 %v3324_v9, %v1349_v62 }
 0x2c7   :  { %v1219_v2 = vpack.c.bf16 %v1126_v59, %v1124_v1  ;;  %v1487_v4 = vmax.f32 %v1350_v54, 0.0  ;;  %v851_v1 = vadd.f32 %v3380_v24, %v3275_v46  ;;  %v853_v59 = vadd.f32 %v3380_v24, %v3284_v0 }
 0x2c9   :  { %1167 = vmatmul.bf16.gmra.mxu2 %v959_v32  ;;  %1391 = vmatmul.bf16.gmra.mxu3 %v1219_v2  ;;  %v1543_v42 = vpack.c.bf16 %v1487_v4, %v1486_v6  ;;  %v926_v4 = vmax.f32 %v851_v1, 0.0  ;;  %v927_v32 = vmax.f32 %v853_v59, 0.0 }
 0x2cb   :  { %1679 = vmatmul.bf16.gmra.mxu0 %v1543_v42 }
 0x2cc   :  { %v1128_v49 = vpop.f32.mrf.mxu2  ;;  %v1352_v8 = vpop.f32.mrf.mxu3 }
 0x2cd   :  { %v1353_v12 = vadd.f32 %v3324_v9, %v1352_v8  ;;  %v1129_v15 = vadd.f32 %v3234_v33, %v1128_v49 }
 0x2cf   :  { %v1488_v19 = vmax.f32 %v1353_v12, 0.0 }
 0x2d4   :  { %v1130_v13 = vpop.f32.mrf.mxu2  ;;  %v1354_v40 = vpop.f32.mrf.mxu3 }
 0x2d5   :  { %v1131_v63 = vadd.f32 %v3234_v33, %v1130_v13  ;;  %v1355_v18 = vadd.f32 %v3324_v9, %v1354_v40 }
 0x2d7   :  { %v1220_v60 = vpack.c.bf16 %v1131_v63, %v1129_v15  ;;  %v1489_v14 = vmax.f32 %v1355_v18, 0.0  ;;  %v962_v15 = vpack.c.bf16 %v927_v32, %v926_v4 }
 0x2d8   :  { %v1645_v61 = vpop.f32.mrf.mxu0 }
 0x2d9   :  { %1172 = vmatmul.bf16.gmra.mxu2 %v960_v17  ;;  %1396 = vmatmul.bf16.gmra.mxu3 %v1220_v60  ;;  %v1544_v5 = vpack.c.bf16 %v1489_v14, %v1488_v19  ;;  %v1646_v35 = vadd.f32 %v3409_v20, %v1645_v61  ;;  %v856_v14 = vadd.f32 %v3380_v24, %v3287_v7 }
 0x2da   :  { %v858_v17 = vadd.f32 %v3380_v24, %v3295_v22 }
 0x2db   :  { %1684 = vmatmul.bf16.gmra.mxu0 %v1544_v5  ;;  %v1805_v38 = vmax.f32 %v1646_v35, 0.0 }
 0x2dc   :  { %v1133_v25 = vpop.f32.mrf.mxu2  ;;  %v1357_v26 = vpop.f32.mrf.mxu3  ;;  %v929_v31 = vmax.f32 %v858_v17, 0.0 }
 0x2dd   :  { %v1358_v41 = vadd.f32 %v3324_v9, %v1357_v26  ;;  %v1134_v23 = vadd.f32 %v3234_v33, %v1133_v25  ;;  %v928_v26 = vmax.f32 %v856_v14, 0.0 }
 0x2df   :  { %v1490_v47 = vmax.f32 %v1358_v41, 0.0 }
 0x2e0   :  { %v1647_v36 = vpop.f32.mrf.mxu0 }
 0x2e1   :  { %v1648_v27 = vadd.f32 %v3409_v20, %v1647_v36 }
 0x2e3   :  { %v1806_v44 = vmax.f32 %v1648_v27, 0.0 }
 0x2e4   :  { %v1135_v28 = vpop.f32.mrf.mxu2  ;;  %v1359_v45 = vpop.f32.mrf.mxu3 }
 0x2e5   :  { %v1869_v30 = vpack.c.bf16 %v1806_v44, %v1805_v38  ;;  %v1136_v21 = vadd.f32 %v3234_v33, %v1135_v28  ;;  %v1360_v29 = vadd.f32 %v3324_v9, %v1359_v45  ;;  %v963_v45 = vpack.c.bf16 %v929_v31, %v928_v26 }
 0x2e7   :  { %v1221_v50 = vpack.c.bf16 %v1136_v21, %v1134_v23  ;;  %v1491_v51 = vmax.f32 %v1360_v29, 0.0  ;;  %1977 = vmatmul.bf16.vlgmr.msrb.gmra.mxu1 %v1869_v30 }
 0x2e8   :  { %v1650_v53 = vpop.f32.mrf.mxu0 }
 0x2e9   :  { %1177 = vmatmul.bf16.gmra.mxu2 %v961_v52  ;;  %1401 = vmatmul.bf16.gmra.mxu3 %v1221_v50  ;;  %v1545_v56 = vpack.c.bf16 %v1491_v51, %v1490_v47  ;;  %v1651_v54 = vadd.f32 %v3409_v20, %v1650_v53  ;;  %v861_v47 = vadd.f32 %v3380_v24, %v3301_v39 }
 0x2ea   :  { %v863_v50 = vadd.f32 %v3380_v24, %v3306_v48 }
 0x2eb   :  { %1689 = vmatmul.bf16.gmra.mxu0 %v1545_v56  ;;  %v1807_v42 = vmax.f32 %v1651_v54, 0.0  ;;  %v930_v56 = vmax.f32 %v861_v47, 0.0 }
 0x2ec   :  { %v1138_v58 = vpop.f32.mrf.mxu2  ;;  %v1362_v62 = vpop.f32.mrf.mxu3 }
 0x2ed   :  { %v1363_v49 = vadd.f32 %v3324_v9, %v1362_v62  ;;  %v1139_v3 = vadd.f32 %v3234_v33, %v1138_v58  ;;  %v931_v58 = vmax.f32 %v863_v50, 0.0 }
 0x2ef   :  { %v1492_v12 = vmax.f32 %v1363_v49, 0.0 }
 0x2f0   :  { %v1652_v6 = vpop.f32.mrf.mxu0 }
 0x2f1   :  { %v1653_v2 = vadd.f32 %v3409_v20, %v1652_v6 }
 0x2f3   :  { %v1808_v8 = vmax.f32 %v1653_v2, 0.0 }
 0x2f4   :  { %v1140_v10 = vpop.f32.mrf.mxu2  ;;  %v1364_v11 = vpop.f32.mrf.mxu3 }
 0x2f5   :  { %v1141_v46 = vadd.f32 %v3234_v33, %v1140_v10  ;;  %v1365_v16 = vadd.f32 %v3324_v9, %v1364_v11  ;;  %v1870_v0 = vpack.c.bf16 %v1808_v8, %v1807_v42  ;;  %v964_v8 = vpack.c.bf16 %v931_v58, %v930_v56 }
 0x2f7   :  { %v1222_v13 = vpack.c.bf16 %v1141_v46, %v1139_v3  ;;  %v1493_v40 = vmax.f32 %v1365_v16, 0.0  ;;  %1982 = vmatmul.bf16.gmra.mxu1 %v1870_v0  ;;  %v866_v16 = vadd.f32 %v3380_v24, %v3311_v55  ;;  %v868_v0 = vadd.f32 %v3380_v24, %v3313_v57 }
 0x2f8   :  { %v1655_v63 = vpop.f32.mrf.mxu0 }
 0x2f9   :  { %1182 = vmatmul.bf16.gmra.mxu2 %v962_v15  ;;  %1406 = vmatmul.bf16.gmra.mxu3 %v1222_v13  ;;  %v1546_v18 = vpack.c.bf16 %v1493_v40, %v1492_v12  ;;  %v1656_v61 = vadd.f32 %v3409_v20, %v1655_v63  ;;  %v932_v15 = vmax.f32 %v866_v16, 0.0  ;;  %v933_v63 = vmax.f32 %v868_v0, 0.0 }
 0x2fb   :  { %1694 = vmatmul.bf16.gmra.mxu0 %v1546_v18  ;;  %v1809_v34 = vmax.f32 %v1656_v61, 0.0  ;;  %v965_v31 = vpack.c.bf16 %v933_v63, %v932_v15 }
 0x2fc   :  { %v1143_v19 = vpop.f32.mrf.mxu2  ;;  %v1367_v60 = vpop.f32.mrf.mxu3 }
 0x2fd   :  { %v1368_v35 = vadd.f32 %v3324_v9, %v1367_v60  ;;  %v1144_v37 = vadd.f32 %v3234_v33, %v1143_v19 }
 0x2ff   :  { %v1494_v41 = vmax.f32 %v1368_v35, 0.0 }
 0x300   :  { %v1657_v5 = vpop.f32.mrf.mxu0 }
 0x301   :  { %v1658_v25 = vadd.f32 %v3409_v20, %v1657_v5 }
 0x303   :  { %v1810_v36 = vmax.f32 %v1658_v25, 0.0 }
 0x304   :  { %v1145_v27 = vpop.f32.mrf.mxu2  ;;  %v1369_v43 = vpop.f32.mrf.mxu3 }
 0x305   :  { %v1146_v7 = vadd.f32 %v3234_v33, %v1145_v27  ;;  %v1370_v38 = vadd.f32 %v3324_v9, %v1369_v43  ;;  %v1871_v22 = vpack.c.bf16 %v1810_v36, %v1809_v34 }
 0x307   :  { %v1223_v44 = vpack.c.bf16 %v1146_v7, %v1144_v37  ;;  %v1495_v28 = vmax.f32 %v1370_v38, 0.0  ;;  %1987 = vmatmul.bf16.gmra.mxu1 %v1871_v22 }
 0x308   :  { %v1660_v23 = vpop.f32.mrf.mxu0 }
 0x309   :  { %1187 = vmatmul.bf16.gmra.mxu2 %v963_v45  ;;  %1411 = vmatmul.bf16.gmra.mxu3 %v1223_v44  ;;  %v1547_v30 = vpack.c.bf16 %v1495_v28, %v1494_v41  ;;  %v1661_v51 = vadd.f32 %v3409_v20, %v1660_v23 }
 0x30b   :  { %1699 = vmatmul.bf16.gmra.mxu0 %v1547_v30  ;;  %v1811_v62 = vmax.f32 %v1661_v51, 0.0 }
 0x30c   :  { %v1148_v21 = vpop.f32.mrf.mxu2  ;;  %v1372_v29 = vpop.f32.mrf.mxu3 }
 0x30d   :  { %v1373_v1 = vadd.f32 %v3324_v9, %v1372_v29  ;;  %v1149_v2 = vadd.f32 %v3234_v33, %v1148_v21 }
 0x30f   :  { %v1496_v32 = vmax.f32 %v1373_v1, 0.0 }
 0x310   :  { %v1662_v52 = vpop.f32.mrf.mxu0 }
 0x311   :  { %v1663_v53 = vadd.f32 %v3409_v20, %v1662_v52 }
 0x313   :  { %v1812_v59 = vmax.f32 %v1663_v53, 0.0 }
 0x314   :  { %v1150_v54 = vpop.f32.mrf.mxu2  ;;  %v1374_v6 = vpop.f32.mrf.mxu3 }
 0x315   :  { %v1151_v39 = vadd.f32 %v3234_v33, %v1150_v54  ;;  %v1375_v4 = vadd.f32 %v3324_v9, %v1374_v6  ;;  %v1872_v48 = vpack.c.bf16 %v1812_v59, %v1811_v62 }
 0x317   :  { %v1224_v42 = vpack.c.bf16 %v1151_v39, %v1149_v2  ;;  %v1497_v49 = vmax.f32 %v1375_v4, 0.0  ;;  %1992 = vmatmul.bf16.gmra.mxu1 %v1872_v48 }
 0x318   :  { %v1665_v10 = vpop.f32.mrf.mxu0 }
 0x319   :  { %1192 = vmatmul.bf16.gmra.mxu2 %v964_v8  ;;  %1416 = vmatmul.bf16.gmra.mxu3 %v1224_v42  ;;  %v1548_v11 = vpack.c.bf16 %v1497_v49, %v1496_v32  ;;  %v1666_v12 = vadd.f32 %v3409_v20, %v1665_v10 }
 0x31b   :  { %1704 = vmatmul.bf16.gmra.mxu0 %v1548_v11  ;;  %v1813_v18 = vmax.f32 %v1666_v12, 0.0 }
 0x31c   :  { %v1153_v3 = vpop.f32.mrf.mxu2  ;;  %v1377_v46 = vpop.f32.mrf.mxu3 }
 0x31d   :  { %v1378_v19 = vadd.f32 %v3324_v9, %v1377_v46  ;;  %v1154_v61 = vadd.f32 %v3234_v33, %v1153_v3 }
 0x31f   :  { %v1498_v24 = vmax.f32 %v1378_v19, 0.0  ;;  %v3479_v19 = vld [vmem:[%s3858_s6] ss:$0 sm:$0xff] }
 0x320   :  { %v1667_v13 = vpop.f32.mrf.mxu0 }
 0x321   :  { %v1668_v40 = vadd.f32 %v3409_v20, %v1667_v13 }
 0x323   :  { %v1814_v60 = vmax.f32 %v1668_v40, 0.0 }
 0x324   :  { %v1155_v14 = vpop.f32.mrf.mxu2  ;;  %v1379_v17 = vpop.f32.mrf.mxu3 }
 0x325   :  { %v1156_v55 = vadd.f32 %v3234_v33, %v1155_v14  ;;  %v1380_v5 = vadd.f32 %v3324_v9, %v1379_v17  ;;  %v1873_v57 = vpack.c.bf16 %v1814_v60, %v1813_v18 }
 0x327   :  { %v1225_v25 = vpack.c.bf16 %v1156_v55, %v1154_v61  ;;  %v1499_v26 = vmax.f32 %v1380_v5, 0.0  ;;  %1997 = vmatmul.bf16.gmra.mxu1 %v1873_v57 }
 0x328   :  { %v1670_v34 = vpop.f32.mrf.mxu0 }
 0x329   :  { %1197 = vmatmul.bf16.gmra.mxu2 %v965_v31  ;;  %1421 = vmatmul.bf16.gmra.mxu3 %v1225_v25  ;;  %v1549_v35 = vpack.c.bf16 %v1499_v26, %v1498_v24  ;;  %v1671_v43 = vadd.f32 %v3409_v20, %v1670_v34 }
 0x32b   :  { %1709 = vmatmul.bf16.gmra.mxu0 %v1549_v35  ;;  %v1815_v38 = vmax.f32 %v1671_v43, 0.0 }
 0x32c   :  { %v1158_v36 = vpop.f32.mrf.mxu2  ;;  %v1382_v27 = vpop.f32.mrf.mxu3 }
 0x32d   :  { %v1383_v22 = vadd.f32 %v3324_v9, %v1382_v27  ;;  %v1159_v45 = vadd.f32 %v3234_v33, %v1158_v36  ;;  %v3489_v27 = vld [vmem:[%s3862_s12] ss:$0 sm:$0xff] }
 0x32f   :  { %v1500_v29 = vmax.f32 %v1383_v22, 0.0 }
 0x330   :  { %v1672_v37 = vpop.f32.mrf.mxu0 }
 0x331   :  { %v1673_v7 = vadd.f32 %v3409_v20, %v1672_v37 }
 0x333   :  { %v1816_v41 = vmax.f32 %v1673_v7, 0.0 }
 0x334   :  { %v1160_v44 = vpop.f32.mrf.mxu2  ;;  %v1384_v28 = vpop.f32.mrf.mxu3 }
 0x335   :  { %v1161_v23 = vadd.f32 %v3234_v33, %v1160_v44  ;;  %v1385_v30 = vadd.f32 %v3324_v9, %v1384_v28  ;;  %v1874_v21 = vpack.c.bf16 %v1816_v41, %v1815_v38 }
 0x337   :  { %v1226_v47 = vpack.c.bf16 %v1161_v23, %v1159_v45  ;;  %v1501_v50 = vmax.f32 %v1385_v30, 0.0  ;;  %2002 = vmatmul.bf16.gmra.mxu1 %v1874_v21 }
 0x338   :  { %v1675_v51 = vpop.f32.mrf.mxu0 }
 0x339   :  { %1426 = vmatmul.bf16.gmra.mxu3 %v1226_v47  ;;  %v1550_v52 = vpack.c.bf16 %v1501_v50, %v1500_v29  ;;  %v1676_v58 = vadd.f32 %v3409_v20, %v1675_v51 }
 0x33b   :  { %1714 = vmatmul.bf16.gmra.mxu0 %v1550_v52  ;;  %v1817_v59 = vmax.f32 %v1676_v58, 0.0 }
 0x33c   :  { %v1163_v53 = vpop.f32.mrf.mxu2  ;;  %v1387_v56 = vpop.f32.mrf.mxu3 }
 0x33d   :  { %v1388_v54 = vadd.f32 %v3324_v9, %v1387_v56  ;;  %v1164_v4 = vadd.f32 %v3234_v33, %v1163_v53 }
 0x33f   :  { %v1502_v49 = vmax.f32 %v1388_v54, 0.0 }
 0x340   :  { %v1677_v62 = vpop.f32.mrf.mxu0 }
 0x341   :  { %v1678_v1 = vadd.f32 %v3409_v20, %v1677_v62 }
 0x343   :  { %v1818_v6 = vmax.f32 %v1678_v1, 0.0 }
 0x344   :  { %v1165_v2 = vpop.f32.mrf.mxu2  ;;  %v1389_v39 = vpop.f32.mrf.mxu3 }
 0x345   :  { %v1166_v48 = vadd.f32 %v3234_v33, %v1165_v2  ;;  %v1390_v32 = vadd.f32 %v3324_v9, %v1389_v39  ;;  %v1875_v42 = vpack.c.bf16 %v1818_v6, %v1817_v59 }
 0x347   :  { %v1227_v8 = vpack.c.bf16 %v1166_v48, %v1164_v4  ;;  %v1503_v10 = vmax.f32 %v1390_v32, 0.0  ;;  %2007 = vmatmul.bf16.gmra.mxu1 %v1875_v42 }
 0x348   :  { %v1680_v11 = vpop.f32.mrf.mxu0 }
 0x349   :  { %1431 = vmatmul.bf16.gmra.mxu3 %v1227_v8  ;;  %v1551_v3 = vpack.c.bf16 %v1503_v10, %v1502_v49  ;;  %v1681_v0 = vadd.f32 %v3409_v20, %v1680_v11 }
 0x34b   :  { %1719 = vmatmul.bf16.gmra.mxu0 %v1551_v3  ;;  %v1819_v40 = vmax.f32 %v1681_v0, 0.0 }
 0x34c   :  { %v1168_v46 = vpop.f32.mrf.mxu2  ;;  %v1392_v16 = vpop.f32.mrf.mxu3 }
 0x34d   :  { %v1393_v33 = vadd.f32 %v3324_v9, %v1392_v16  ;;  %v1169_v60 = vadd.f32 %v3479_v19, %v1168_v46 }
 0x34f   :  { %v1504_v55 = vmax.f32 %v1393_v33, 0.0 }
 0x350   :  { %v1682_v12 = vpop.f32.mrf.mxu0 }
 0x351   :  { %v1683_v13 = vadd.f32 %v3409_v20, %v1682_v12 }
 0x353   :  { %v1820_v15 = vmax.f32 %v1683_v13, 0.0 }
 0x354   :  { %v1170_v63 = vpop.f32.mrf.mxu2  ;;  %v1394_v18 = vpop.f32.mrf.mxu3 }
 0x355   :  { %v1171_v14 = vadd.f32 %v3479_v19, %v1170_v63  ;;  %v1395_v17 = vadd.f32 %v3324_v9, %v1394_v18  ;;  %v1876_v61 = vpack.c.bf16 %v1820_v15, %v1819_v40 }
 0x357   :  { %v1228_v5 = vpack.c.bf16 %v1171_v14, %v1169_v60  ;;  %v1505_v57 = vmax.f32 %v1395_v17, 0.0  ;;  %2012 = vmatmul.bf16.gmra.mxu1 %v1876_v61 }
 0x358   :  { %v1685_v24 = vpop.f32.mrf.mxu0 }
 0x359   :  { %1436 = vmatmul.bf16.gmra.mxu3 %v1228_v5  ;;  %v1552_v25 = vpack.c.bf16 %v1505_v57, %v1504_v55  ;;  %v1686_v34 = vadd.f32 %v3409_v20, %v1685_v24 }
 0x35b   :  { %1724 = vmatmul.bf16.gmra.mxu0 %v1552_v25  ;;  %v1821_v43 = vmax.f32 %v1686_v34, 0.0 }
 0x35c   :  { %v1173_v26 = vpop.f32.mrf.mxu2  ;;  %v1397_v31 = vpop.f32.mrf.mxu3 }
 0x35d   :  { %v1398_v37 = vadd.f32 %v3324_v9, %v1397_v31  ;;  %v1174_v41 = vadd.f32 %v3479_v19, %v1173_v26 }
 0x35f   :  { %v1506_v21 = vmax.f32 %v1398_v37, 0.0 }
 0x360   :  { %v1687_v35 = vpop.f32.mrf.mxu0 }
 0x361   :  { %v1688_v36 = vadd.f32 %v3409_v20, %v1687_v35 }
 0x363   :  { %v1822_v7 = vmax.f32 %v1688_v36, 0.0 }
 0x364   :  { %v1175_v38 = vpop.f32.mrf.mxu2  ;;  %v1399_v22 = vpop.f32.mrf.mxu3 }
 0x365   :  { %v1176_v44 = vadd.f32 %v3479_v19, %v1175_v38  ;;  %v1400_v28 = vadd.f32 %v3324_v9, %v1399_v22  ;;  %v1978_v45 = vpop.f32.mrf.mxu1  ;;  %v1877_v23 = vpack.c.bf16 %v1822_v7, %v1821_v43 }
 0x366   :  { %v1979_v30 = vadd.f32 %v3489_v27, %v1978_v45 }
 0x367   :  { %v1229_v29 = vpack.c.bf16 %v1176_v44, %v1174_v41  ;;  %v1507_v47 = vmax.f32 %v1400_v28, 0.0  ;;  %2017 = vmatmul.bf16.gmra.mxu1 %v1877_v23 }
 0x368   :  { %2692 = vtanh.f32 %v1979_v30  ;;  %v1690_v50 = vpop.f32.mrf.mxu0 }
 0x369   :  { %1441 = vmatmul.bf16.gmra.mxu3 %v1229_v29  ;;  %v1553_v51 = vpack.c.bf16 %v1507_v47, %v1506_v21  ;;  %v1691_v1 = vadd.f32 %v3409_v20, %v1690_v50 }
 0x36b   :  { %1729 = vmatmul.bf16.gmra.mxu0 %v1553_v51  ;;  %v1823_v6 = vmax.f32 %v1691_v1, 0.0 }
 0x36c   :  { %v1178_v52 = vpop.f32.mrf.mxu2  ;;  %v1402_v53 = vpop.f32.mrf.mxu3 }
 0x36d   :  { %v1980_v56 = vpop.f32.mrf.mxu1  ;;  %v1403_v2 = vadd.f32 %v3324_v9, %v1402_v53  ;;  %v1179_v32 = vadd.f32 %v3479_v19, %v1178_v52 }
 0x36e   :  { %v2693_v58 = vpop.eup %2692  ;;  %v1981_v62 = vadd.f32 %v3489_v27, %v1980_v56 }
 0x36f   :  { %2202 = vst [vmem:[%s3863_s13] sm:$0xff] %v2693_v58  ;;  %v1508_v46 = vmax.f32 %v1403_v2, 0.0 }
 0x370   :  { %2694 = vtanh.f32 %v1981_v62  ;;  %v1692_v59 = vpop.f32.mrf.mxu0 }
 0x371   :  { %v1693_v54 = vadd.f32 %v3409_v20, %v1692_v59 }
 0x373   :  { %v1824_v39 = vmax.f32 %v1693_v54, 0.0 }
 0x374   :  { %v1180_v4 = vpop.f32.mrf.mxu2  ;;  %v1404_v48 = vpop.f32.mrf.mxu3 }
 0x375   :  { %v1181_v42 = vadd.f32 %v3479_v19, %v1180_v4  ;;  %v1405_v49 = vadd.f32 %v3324_v9, %v1404_v48  ;;  %v1983_v8 = vpop.f32.mrf.mxu1  ;;  %v1878_v10 = vpack.c.bf16 %v1824_v39, %v1823_v6 }
 0x376   :  { %v2695_v11 = vpop.eup %2694  ;;  %v1984_v3 = vadd.f32 %v3489_v27, %v1983_v8 }
 0x377   :  { %2203 = vst [vmem:[%s3863_s13 + $0x8] sm:$0xff] %v2695_v11  ;;  %v1230_v16 = vpack.c.bf16 %v1181_v42, %v1179_v32  ;;  %v1509_v0 = vmax.f32 %v1405_v49, 0.0  ;;  %2022 = vmatmul.bf16.gmra.mxu1 %v1878_v10 }
 0x378   :  { %2696 = vtanh.f32 %v1984_v3  ;;  %v1695_v12 = vpop.f32.mrf.mxu0 }
 0x379   :  { %1446 = vmatmul.bf16.gmra.mxu3 %v1230_v16  ;;  %v1554_v13 = vpack.c.bf16 %v1509_v0, %v1508_v46  ;;  %v1696_v60 = vadd.f32 %v3409_v20, %v1695_v12  ;;  %v3547_v12 = vld [vmem:[%s3860_s8] ss:$0 sm:$0xff] }
 0x37b   :  { %1734 = vmatmul.bf16.gmra.mxu0 %v1554_v13  ;;  %v1825_v61 = vmax.f32 %v1696_v60, 0.0 }
 0x37c   :  { %v1183_v40 = vpop.f32.mrf.mxu2  ;;  %v1407_v33 = vpop.f32.mrf.mxu3 }
 0x37d   :  { %v1985_v15 = vpop.f32.mrf.mxu1  ;;  %v1408_v55 = vadd.f32 %v3324_v9, %v1407_v33  ;;  %v1184_v25 = vadd.f32 %v3479_v19, %v1183_v40 }
 0x37e   :  { %v2697_v63 = vpop.eup %2696  ;;  %v1986_v18 = vadd.f32 %v3489_v27, %v1985_v15 }
 0x37f   :  { %2204 = vst [vmem:[%s3863_s13 + $0x10] sm:$0xff] %v2697_v63  ;;  %v1510_v37 = vmax.f32 %v1408_v55, 0.0 }
 0x380   :  { %2698 = vtanh.f32 %v1986_v18  ;;  %v1697_v14 = vpop.f32.mrf.mxu0 }
 0x381   :  { %v1698_v17 = vadd.f32 %v3409_v20, %v1697_v14 }
 0x383   :  { %v1826_v5 = vmax.f32 %v1698_v17, 0.0 }
 0x384   :  { %v1185_v57 = vpop.f32.mrf.mxu2  ;;  %v1409_v24 = vpop.f32.mrf.mxu3 }
 0x385   :  { %v1186_v26 = vadd.f32 %v3479_v19, %v1185_v57  ;;  %v1410_v31 = vadd.f32 %v3324_v9, %v1409_v24  ;;  %v1988_v34 = vpop.f32.mrf.mxu1  ;;  %v1879_v35 = vpack.c.bf16 %v1826_v5, %v1825_v61 }
 0x386   :  { %v2699_v36 = vpop.eup %2698  ;;  %v1989_v43 = vadd.f32 %v3489_v27, %v1988_v34 }
 0x387   :  { %2205 = vst [vmem:[%s3863_s13 + $0x18] sm:$0xff] %v2699_v36  ;;  %v1231_v7 = vpack.c.bf16 %v1186_v26, %v1184_v25  ;;  %v1511_v38 = vmax.f32 %v1410_v31, 0.0  ;;  %2027 = vmatmul.bf16.gmra.mxu1 %v1879_v35 }
 0x388   :  { %2700 = vtanh.f32 %v1989_v43  ;;  %v1700_v22 = vpop.f32.mrf.mxu0 }
 0x389   :  { %1451 = vmatmul.bf16.gmra.mxu3 %v1231_v7  ;;  %v1555_v41 = vpack.c.bf16 %v1511_v38, %v1510_v37  ;;  %v1701_v21 = vadd.f32 %v3409_v20, %v1700_v22 }
 0x38b   :  { %1739 = vmatmul.bf16.gmra.mxu0 %v1555_v41  ;;  %v1827_v50 = vmax.f32 %v1701_v21, 0.0 }
 0x38c   :  { %v1188_v44 = vpop.f32.mrf.mxu2  ;;  %v1412_v28 = vpop.f32.mrf.mxu3 }
 0x38d   :  { %v1990_v45 = vpop.f32.mrf.mxu1  ;;  %v1413_v51 = vadd.f32 %v3324_v9, %v1412_v28  ;;  %v1189_v58 = vadd.f32 %v3479_v19, %v1188_v44 }
 0x38e   :  { %v2701_v23 = vpop.eup %2700  ;;  %v1991_v30 = vadd.f32 %v3489_v27, %v1990_v45 }
 0x38f   :  { %2206 = vst [vmem:[%s3863_s13 + $0x20] sm:$0xff] %v2701_v23  ;;  %v1512_v39 = vmax.f32 %v1413_v51, 0.0 }
 0x390   :  { %2702 = vtanh.f32 %v1991_v30  ;;  %v1702_v29 = vpop.f32.mrf.mxu0 }
 0x391   :  { %v1703_v47 = vadd.f32 %v3409_v20, %v1702_v29 }
 0x393   :  { %v1828_v52 = vmax.f32 %v1703_v47, 0.0 }
 0x394   :  { %v1190_v53 = vpop.f32.mrf.mxu2  ;;  %v1414_v56 = vpop.f32.mrf.mxu3 }
 0x395   :  { %v1191_v62 = vadd.f32 %v3479_v19, %v1190_v53  ;;  %v1415_v1 = vadd.f32 %v3324_v9, %v1414_v56  ;;  %v1993_v59 = vpop.f32.mrf.mxu1  ;;  %v1880_v54 = vpack.c.bf16 %v1828_v52, %v1827_v50 }
 0x396   :  { %v2703_v6 = vpop.eup %2702  ;;  %v1994_v2 = vadd.f32 %v3489_v27, %v1993_v59 }
 0x397   :  { %2207 = vst [vmem:[%s3863_s13 + $0x28] sm:$0xff] %v2703_v6  ;;  %v1232_v4 = vpack.c.bf16 %v1191_v62, %v1189_v58  ;;  %v1513_v48 = vmax.f32 %v1415_v1, 0.0  ;;  %2032 = vmatmul.bf16.gmra.mxu1 %v1880_v54 }
 0x398   :  { %2704 = vtanh.f32 %v1994_v2  ;;  %v1705_v32 = vpop.f32.mrf.mxu0 }
 0x399   :  { %v1556_v42 = vpack.c.bf16 %v1513_v48, %v1512_v39  ;;  %1456 = vmatmul.bf16.gmra.mxu3 %v1232_v4  ;;  %v1706_v3 = vadd.f32 %v3409_v20, %v1705_v32 }
 0x39b   :  { %1744 = vmatmul.bf16.gmra.mxu0 %v1556_v42  ;;  %v1829_v0 = vmax.f32 %v1706_v3, 0.0 }
 0x39c   :  { %v1193_v49 = vpop.f32.mrf.mxu2  ;;  %v1417_v9 = vpop.f32.mrf.mxu3 }
 0x39d   :  { %v1995_v8 = vpop.f32.mrf.mxu1  ;;  %v1418_v13 = vadd.f32 %v3547_v12, %v1417_v9  ;;  %v1194_v63 = vadd.f32 %v3479_v19, %v1193_v49 }
 0x39e   :  { %v2705_v10 = vpop.eup %2704  ;;  %v1996_v11 = vadd.f32 %v3489_v27, %v1995_v8 }
 0x39f   :  { %2208 = vst [vmem:[%s3863_s13 + $0x30] sm:$0xff] %v2705_v10  ;;  %v1514_v5 = vmax.f32 %v1418_v13, 0.0 }
 0x3a0   :  { %2706 = vtanh.f32 %v1996_v11  ;;  %v1707_v46 = vpop.f32.mrf.mxu0 }
 0x3a1   :  { %v1708_v16 = vadd.f32 %v3409_v20, %v1707_v46 }
 0x3a3   :  { %v1830_v40 = vmax.f32 %v1708_v16, 0.0 }
 0x3a4   :  { %v1195_v33 = vpop.f32.mrf.mxu2  ;;  %v1419_v15 = vpop.f32.mrf.mxu3 }
 0x3a5   :  { %v1196_v18 = vadd.f32 %v3479_v19, %v1195_v33  ;;  %v1420_v60 = vadd.f32 %v3547_v12, %v1419_v15  ;;  %v1998_v14 = vpop.f32.mrf.mxu1  ;;  %v1881_v17 = vpack.c.bf16 %v1830_v40, %v1829_v0 }
 0x3a6   :  { %v2707_v61 = vpop.eup %2706  ;;  %v1999_v55 = vadd.f32 %v3489_v27, %v1998_v14 }
 0x3a7   :  { %2209 = vst [vmem:[%s3863_s13 + $0x38] sm:$0xff] %v2707_v61  ;;  %v1233_v57 = vpack.c.bf16 %v1196_v18, %v1194_v63  ;;  %v1515_v24 = vmax.f32 %v1420_v60, 0.0  ;;  %2037 = vmatmul.bf16.gmra.mxu1 %v1881_v17 }
 0x3a8   :  { %2708 = vtanh.f32 %v1999_v55  ;;  %v1710_v25 = vpop.f32.mrf.mxu0 }
 0x3a9   :  { %v1557_v26 = vpack.c.bf16 %v1515_v24, %v1514_v5  ;;  %1461 = vmatmul.bf16.gmra.mxu3 %v1233_v57  ;;  %v1711_v37 = vadd.f32 %v3409_v20, %v1710_v25 }
 0x3ab   :  { %1749 = vmatmul.bf16.gmra.mxu0 %v1557_v26  ;;  %v1831_v22 = vmax.f32 %v1711_v37, 0.0 }
 0x3ac   :  { %v1198_v31 = vpop.f32.mrf.mxu2  ;;  %v1422_v34 = vpop.f32.mrf.mxu3 }
 0x3ad   :  { %v2000_v35 = vpop.f32.mrf.mxu1  ;;  %v1423_v41 = vadd.f32 %v3547_v12, %v1422_v34  ;;  %v1199_v23 = vadd.f32 %v3479_v19, %v1198_v31 }
 0x3ae   :  { %v2709_v36 = vpop.eup %2708  ;;  %v2001_v43 = vadd.f32 %v3489_v27, %v2000_v35 }
 0x3af   :  { %2210 = vst [vmem:[%s3863_s13 + $0x40] sm:$0xff] %v2709_v36  ;;  %v1516_v52 = vmax.f32 %v1423_v41, 0.0 }
 0x3b0   :  { %2710 = vtanh.f32 %v2001_v43  ;;  %v1712_v7 = vpop.f32.mrf.mxu0 }
 0x3b1   :  { %v1713_v38 = vadd.f32 %v3409_v20, %v1712_v7 }
 0x3b3   :  { %v1832_v44 = vmax.f32 %v1713_v38, 0.0 }
 0x3b4   :  { %v1200_v28 = vpop.f32.mrf.mxu2  ;;  %v1424_v45 = vpop.f32.mrf.mxu3 }
 0x3b5   :  { %v1201_v30 = vadd.f32 %v3479_v19, %v1200_v28  ;;  %v1425_v21 = vadd.f32 %v3547_v12, %v1424_v45  ;;  %v2003_v29 = vpop.f32.mrf.mxu1  ;;  %v1882_v47 = vpack.c.bf16 %v1832_v44, %v1831_v22 }
 0x3b6   :  { %v2711_v50 = vpop.eup %2710  ;;  %v2004_v51 = vadd.f32 %v3489_v27, %v2003_v29 }
 0x3b7   :  { %2211 = vst [vmem:[%s3863_s13 + $0x48] sm:$0xff] %v2711_v50  ;;  %v1234_v53 = vpack.c.bf16 %v1201_v30, %v1199_v23  ;;  %v1517_v56 = vmax.f32 %v1425_v21, 0.0  ;;  %2042 = vmatmul.bf16.gmra.mxu1 %v1882_v47 }
 0x3b8   :  { %2712 = vtanh.f32 %v2004_v51  ;;  %v1715_v58 = vpop.f32.mrf.mxu0 }
 0x3b9   :  { %v1558_v62 = vpack.c.bf16 %v1517_v56, %v1516_v52  ;;  %1466 = vmatmul.bf16.gmra.mxu3 %v1234_v53  ;;  %v1716_v6 = vadd.f32 %v3409_v20, %v1715_v58 }
 0x3bb   :  { %1754 = vmatmul.bf16.gmra.mxu0 %v1558_v62  ;;  %v1833_v4 = vmax.f32 %v1716_v6, 0.0 }
 0x3bc   :  { %v1427_v19 = vpop.f32.mrf.mxu3 }
 0x3bd   :  { %v2005_v1 = vpop.f32.mrf.mxu1  ;;  %v1428_v48 = vadd.f32 %v3547_v12, %v1427_v19 }
 0x3be   :  { %v2713_v59 = vpop.eup %2712  ;;  %v2006_v54 = vadd.f32 %v3489_v27, %v2005_v1 }
 0x3bf   :  { %2212 = vst [vmem:[%s3863_s13 + $0x50] sm:$0xff] %v2713_v59  ;;  %v1518_v3 = vmax.f32 %v1428_v48, 0.0 }
 0x3c0   :  { %2714 = vtanh.f32 %v2006_v54  ;;  %v1717_v2 = vpop.f32.mrf.mxu0 }
 0x3c1   :  { %v1718_v39 = vadd.f32 %v3409_v20, %v1717_v2 }
 0x3c3   :  { %v1834_v32 = vmax.f32 %v1718_v39, 0.0 }
 0x3c4   :  { %v1429_v42 = vpop.f32.mrf.mxu3 }
 0x3c5   :  { %v1430_v49 = vadd.f32 %v3547_v12, %v1429_v42  ;;  %v2008_v9 = vpop.f32.mrf.mxu1  ;;  %v1883_v8 = vpack.c.bf16 %v1834_v32, %v1833_v4 }
 0x3c6   :  { %v2715_v10 = vpop.eup %2714  ;;  %v2009_v11 = vadd.f32 %v3489_v27, %v2008_v9 }
 0x3c7   :  { %2213 = vst [vmem:[%s3863_s13 + $0x58] sm:$0xff] %v2715_v10  ;;  %v1519_v46 = vmax.f32 %v1430_v49, 0.0  ;;  %2047 = vmatmul.bf16.gmra.mxu1 %v1883_v8 }
 0x3c8   :  { %2716 = vtanh.f32 %v2009_v11  ;;  %v1720_v16 = vpop.f32.mrf.mxu0 }
 0x3c9   :  { %v1559_v0 = vpack.c.bf16 %v1519_v46, %v1518_v3  ;;  %v1721_v63 = vadd.f32 %v3409_v20, %v1720_v16 }
 0x3cb   :  { %1759 = vmatmul.bf16.gmra.mxu0 %v1559_v0  ;;  %v1835_v14 = vmax.f32 %v1721_v63, 0.0 }
 0x3cc   :  { %v1432_v13 = vpop.f32.mrf.mxu3 }
 0x3cd   :  { %v2010_v40 = vpop.f32.mrf.mxu1  ;;  %v1433_v17 = vadd.f32 %v3547_v12, %v1432_v13 }
 0x3ce   :  { %v2717_v33 = vpop.eup %2716  ;;  %v2011_v15 = vadd.f32 %v3489_v27, %v2010_v40 }
 0x3cf   :  { %2214 = vst [vmem:[%s3863_s13 + $0x60] sm:$0xff] %v2717_v33  ;;  %v1520_v31 = vmax.f32 %v1433_v17, 0.0 }
 0x3d0   :  { %2718 = vtanh.f32 %v2011_v15  ;;  %v1722_v18 = vpop.f32.mrf.mxu0 }
 0x3d1   :  { %v1723_v60 = vadd.f32 %v3409_v20, %v1722_v18 }
 0x3d3   :  { %v1836_v61 = vmax.f32 %v1723_v60, 0.0 }
 0x3d4   :  { %v1434_v55 = vpop.f32.mrf.mxu3 }
 0x3d5   :  { %v1435_v5 = vadd.f32 %v3547_v12, %v1434_v55  ;;  %v2013_v57 = vpop.f32.mrf.mxu1  ;;  %v1884_v24 = vpack.c.bf16 %v1836_v61, %v1835_v14 }
 0x3d6   :  { %v2719_v25 = vpop.eup %2718  ;;  %v2014_v26 = vadd.f32 %v3489_v27, %v2013_v57 }
 0x3d7   :  { %2215 = vst [vmem:[%s3863_s13 + $0x68] sm:$0xff] %v2719_v25  ;;  %v1521_v34 = vmax.f32 %v1435_v5, 0.0  ;;  %2052 = vmatmul.bf16.gmra.mxu1 %v1884_v24 }
 0x3d8   :  { %2720 = vtanh.f32 %v2014_v26  ;;  %v1725_v35 = vpop.f32.mrf.mxu0 }
 0x3d9   :  { %v1560_v36 = vpack.c.bf16 %v1521_v34, %v1520_v31  ;;  %v1726_v22 = vadd.f32 %v3409_v20, %v1725_v35 }
 0x3db   :  { %1764 = vmatmul.bf16.gmra.mxu0 %v1560_v36  ;;  %v1837_v28 = vmax.f32 %v1726_v22, 0.0 }
 0x3dc   :  { %v1437_v43 = vpop.f32.mrf.mxu3 }
 0x3dd   :  { %v2015_v37 = vpop.f32.mrf.mxu1  ;;  %v1438_v45 = vadd.f32 %v3547_v12, %v1437_v43 }
 0x3de   :  { %v2721_v7 = vpop.eup %2720  ;;  %v2016_v38 = vadd.f32 %v3489_v27, %v2015_v37 }
 0x3df   :  { %2216 = vst [vmem:[%s3863_s13 + $0x70] sm:$0xff] %v2721_v7  ;;  %v1522_v52 = vmax.f32 %v1438_v45, 0.0  ;;  %v3638_v7 = vld [vmem:[%s3861_s10] ss:$0 sm:$0xff] }
 0x3e0   :  { %2722 = vtanh.f32 %v2016_v38  ;;  %v1727_v41 = vpop.f32.mrf.mxu0 }
 0x3e1   :  { %v1728_v44 = vadd.f32 %v3409_v20, %v1727_v41 }
 0x3e3   :  { %v1838_v23 = vmax.f32 %v1728_v44, 0.0 }
 0x3e4   :  { %v1439_v30 = vpop.f32.mrf.mxu3 }
 0x3e5   :  { %v1440_v21 = vadd.f32 %v3547_v12, %v1439_v30  ;;  %v2018_v29 = vpop.f32.mrf.mxu1  ;;  %v1885_v47 = vpack.c.bf16 %v1838_v23, %v1837_v28 }
 0x3e6   :  { %v2723_v50 = vpop.eup %2722  ;;  %v2019_v51 = vadd.f32 %v3489_v27, %v2018_v29 }
 0x3e7   :  { %2217 = vst [vmem:[%s3863_s13 + $0x78] sm:$0xff] %v2723_v50  ;;  %v1523_v53 = vmax.f32 %v1440_v21, 0.0  ;;  %2057 = vmatmul.bf16.gmra.mxu1 %v1885_v47 }
 0x3e8   :  { %2724 = vtanh.f32 %v2019_v51  ;;  %v1730_v56 = vpop.f32.mrf.mxu0 }
 0x3e9   :  { %v1561_v58 = vpack.c.bf16 %v1523_v53, %v1522_v52  ;;  %v1731_v54 = vadd.f32 %v3409_v20, %v1730_v56 }
 0x3eb   :  { %1769 = vmatmul.bf16.gmra.mxu0 %v1561_v58  ;;  %v1839_v39 = vmax.f32 %v1731_v54, 0.0 }
 0x3ec   :  { %v1442_v62 = vpop.f32.mrf.mxu3 }
 0x3ed   :  { %v2020_v19 = vpop.f32.mrf.mxu1  ;;  %v1443_v4 = vadd.f32 %v3547_v12, %v1442_v62 }
 0x3ee   :  { %v2725_v1 = vpop.eup %2724  ;;  %v2021_v59 = vadd.f32 %v3489_v27, %v2020_v19 }
 0x3ef   :  { %2218 = vst [vmem:[%s3863_s13 + $0x80] sm:$0xff] %v2725_v1  ;;  %v1524_v11 = vmax.f32 %v1443_v4, 0.0 }
 0x3f0   :  { %2726 = vtanh.f32 %v2021_v59  ;;  %v1732_v6 = vpop.f32.mrf.mxu0 }
 0x3f1   :  { %v1733_v2 = vadd.f32 %v3409_v20, %v1732_v6 }
 0x3f3   :  { %v1840_v48 = vmax.f32 %v1733_v2, 0.0 }
 0x3f4   :  { %v1444_v32 = vpop.f32.mrf.mxu3 }
 0x3f5   :  { %v1445_v42 = vadd.f32 %v3547_v12, %v1444_v32  ;;  %v2023_v49 = vpop.f32.mrf.mxu1  ;;  %v1886_v9 = vpack.c.bf16 %v1840_v48, %v1839_v39 }
 0x3f6   :  { %v2727_v8 = vpop.eup %2726  ;;  %v2024_v10 = vadd.f32 %v3489_v27, %v2023_v49 }
 0x3f7   :  { %2219 = vst [vmem:[%s3863_s13 + $0x88] sm:$0xff] %v2727_v8  ;;  %v1525_v3 = vmax.f32 %v1445_v42, 0.0  ;;  %2062 = vmatmul.bf16.gmra.mxu1 %v1886_v9 }
 0x3f8   :  { %2728 = vtanh.f32 %v2024_v10  ;;  %v1735_v46 = vpop.f32.mrf.mxu0 }
 0x3f9   :  { %v1562_v16 = vpack.c.bf16 %v1525_v3, %v1524_v11  ;;  %v1736_v15 = vadd.f32 %v3409_v20, %v1735_v46 }
 0x3fb   :  { %1774 = vmatmul.bf16.gmra.mxu0 %v1562_v16  ;;  %v1841_v60 = vmax.f32 %v1736_v15, 0.0 }
 0x3fc   :  { %v1447_v0 = vpop.f32.mrf.mxu3 }
 0x3fd   :  { %v2025_v13 = vpop.f32.mrf.mxu1  ;;  %v1448_v14 = vadd.f32 %v3547_v12, %v1447_v0 }
 0x3fe   :  { %v2729_v40 = vpop.eup %2728  ;;  %v2026_v33 = vadd.f32 %v3489_v27, %v2025_v13 }
 0x3ff   :  { %2220 = vst [vmem:[%s3863_s13 + $0x90] sm:$0xff] %v2729_v40  ;;  %v1526_v26 = vmax.f32 %v1448_v14, 0.0 }
 0x400   :  { %2730 = vtanh.f32 %v2026_v33  ;;  %v1737_v63 = vpop.f32.mrf.mxu0 }
 0x401   :  { %v1738_v18 = vadd.f32 %v3409_v20, %v1737_v63 }
 0x403   :  { %v1842_v17 = vmax.f32 %v1738_v18, 0.0 }
 0x404   :  { %v1449_v61 = vpop.f32.mrf.mxu3 }
 0x405   :  { %v1450_v55 = vadd.f32 %v3547_v12, %v1449_v61  ;;  %v2028_v5 = vpop.f32.mrf.mxu1  ;;  %v1887_v57 = vpack.c.bf16 %v1842_v17, %v1841_v60 }
 0x406   :  { %v2731_v24 = vpop.eup %2730  ;;  %v2029_v25 = vadd.f32 %v3489_v27, %v2028_v5 }
 0x407   :  { %2221 = vst [vmem:[%s3863_s13 + $0x98] sm:$0xff] %v2731_v24  ;;  %v1527_v31 = vmax.f32 %v1450_v55, 0.0  ;;  %2067 = vmatmul.bf16.gmra.mxu1 %v1887_v57 }
 0x408   :  { %2732 = vtanh.f32 %v2029_v25  ;;  %v1740_v20 = vpop.f32.mrf.mxu0 }
 0x409   :  { %v1563_v34 = vpack.c.bf16 %v1527_v31, %v1526_v26  ;;  %v1741_v38 = vadd.f32 %v3638_v7, %v1740_v20 }
 0x40b   :  { %1779 = vmatmul.bf16.gmra.mxu0 %v1563_v34  ;;  %v1843_v44 = vmax.f32 %v1741_v38, 0.0 }
 0x40c   :  { %v1452_v35 = vpop.f32.mrf.mxu3 }
 0x40d   :  { %v2030_v36 = vpop.f32.mrf.mxu1  ;;  %v1453_v28 = vadd.f32 %v3547_v12, %v1452_v35 }
 0x40e   :  { %v2733_v43 = vpop.eup %2732  ;;  %v2031_v37 = vadd.f32 %v3489_v27, %v2030_v36 }
 0x40f   :  { %2222 = vst [vmem:[%s3863_s13 + $0xa0] sm:$0xff] %v2733_v43  ;;  %v1528_v51 = vmax.f32 %v1453_v28, 0.0 }
 0x410   :  { %2734 = vtanh.f32 %v2031_v37  ;;  %v1742_v22 = vpop.f32.mrf.mxu0 }
 0x411   :  { %v1743_v41 = vadd.f32 %v3638_v7, %v1742_v22 }
 0x413   :  { %v1844_v45 = vmax.f32 %v1743_v41, 0.0 }
 0x414   :  { %v1454_v23 = vpop.f32.mrf.mxu3 }
 0x415   :  { %v1455_v30 = vadd.f32 %v3547_v12, %v1454_v23  ;;  %v2033_v21 = vpop.f32.mrf.mxu1  ;;  %v1888_v29 = vpack.c.bf16 %v1844_v45, %v1843_v44 }
 0x416   :  { %v2735_v47 = vpop.eup %2734  ;;  %v2034_v50 = vadd.f32 %v3489_v27, %v2033_v21 }
 0x417   :  { %2223 = vst [vmem:[%s3863_s13 + $0xa8] sm:$0xff] %v2735_v47  ;;  %v1529_v52 = vmax.f32 %v1455_v30, 0.0  ;;  %2072 = vmatmul.bf16.gmra.mxu1 %v1888_v29 }
 0x418   :  { %2736 = vtanh.f32 %v2034_v50  ;;  %v1745_v53 = vpop.f32.mrf.mxu0 }
 0x419   :  { %v1564_v56 = vpack.c.bf16 %v1529_v52, %v1528_v51  ;;  %v1746_v59 = vadd.f32 %v3638_v7, %v1745_v53 }
 0x41b   :  { %1784 = vmatmul.bf16.gmra.mxu0 %v1564_v56  ;;  %v1845_v2 = vmax.f32 %v1746_v59, 0.0 }
 0x41c   :  { %v1457_v58 = vpop.f32.mrf.mxu3 }
 0x41d   :  { %v2035_v62 = vpop.f32.mrf.mxu1  ;;  %v1458_v39 = vadd.f32 %v3547_v12, %v1457_v58 }
 0x41e   :  { %v2737_v19 = vpop.eup %2736  ;;  %v2036_v1 = vadd.f32 %v3489_v27, %v2035_v62 }
 0x41f   :  { %2224 = vst [vmem:[%s3863_s13 + $0xb0] sm:$0xff] %v2737_v19  ;;  %v1530_v10 = vmax.f32 %v1458_v39, 0.0 }
 0x420   :  { %2738 = vtanh.f32 %v2036_v1  ;;  %v1747_v54 = vpop.f32.mrf.mxu0 }
 0x421   :  { %v1748_v6 = vadd.f32 %v3638_v7, %v1747_v54 }
 0x423   :  { %v1846_v4 = vmax.f32 %v1748_v6, 0.0 }
 0x424   :  { %v1459_v48 = vpop.f32.mrf.mxu3 }
 0x425   :  { %v1889_v32 = vpack.c.bf16 %v1846_v4, %v1845_v2  ;;  %v1460_v42 = vadd.f32 %v3547_v12, %v1459_v48  ;;  %v2038_v49 = vpop.f32.mrf.mxu1 }
 0x426   :  { %v2739_v9 = vpop.eup %2738  ;;  %v2039_v8 = vadd.f32 %v3489_v27, %v2038_v49 }
 0x427   :  { %2225 = vst [vmem:[%s3863_s13 + $0xb8] sm:$0xff] %v2739_v9  ;;  %v1531_v11 = vmax.f32 %v1460_v42, 0.0  ;;  %2077 = vmatmul.bf16.gmra.mxu1 %v1889_v32 }
 0x428   :  { %2740 = vtanh.f32 %v2039_v8  ;;  %v1750_v3 = vpop.f32.mrf.mxu0 }
 0x429   :  { %v1565_v46 = vpack.c.bf16 %v1531_v11, %v1530_v10  ;;  %v1751_v33 = vadd.f32 %v3638_v7, %v1750_v3 }
 0x42b   :  { %1789 = vmatmul.bf16.gmra.mxu0 %v1565_v46  ;;  %v1847_v18 = vmax.f32 %v1751_v33, 0.0 }
 0x42c   :  { %v1462_v16 = vpop.f32.mrf.mxu3 }
 0x42d   :  { %v2040_v0 = vpop.f32.mrf.mxu1  ;;  %v1463_v60 = vadd.f32 %v3547_v12, %v1462_v16 }
 0x42e   :  { %v2741_v13 = vpop.eup %2740  ;;  %v2041_v40 = vadd.f32 %v3489_v27, %v2040_v0 }
 0x42f   :  { %2226 = vst [vmem:[%s3863_s13 + $0xc0] sm:$0xff] %v2741_v13  ;;  %v1532_v25 = vmax.f32 %v1463_v60, 0.0 }
 0x430   :  { %2742 = vtanh.f32 %v2041_v40  ;;  %v1752_v15 = vpop.f32.mrf.mxu0 }
 0x431   :  { %v1753_v63 = vadd.f32 %v3638_v7, %v1752_v15 }
 0x433   :  { %v1848_v14 = vmax.f32 %v1753_v63, 0.0 }
 0x434   :  { %v1464_v17 = vpop.f32.mrf.mxu3 }
 0x435   :  { %v1890_v61 = vpack.c.bf16 %v1848_v14, %v1847_v18  ;;  %v1465_v55 = vadd.f32 %v3547_v12, %v1464_v17  ;;  %v2043_v5 = vpop.f32.mrf.mxu1 }
 0x436   :  { %v2743_v57 = vpop.eup %2742  ;;  %v2044_v24 = vadd.f32 %v3489_v27, %v2043_v5 }
 0x437   :  { %2227 = vst [vmem:[%s3863_s13 + $0xc8] sm:$0xff] %v2743_v57  ;;  %v1533_v26 = vmax.f32 %v1465_v55, 0.0  ;;  %2082 = vmatmul.bf16.gmra.mxu1 %v1890_v61 }
 0x438   :  { %2744 = vtanh.f32 %v2044_v24  ;;  %v1755_v31 = vpop.f32.mrf.mxu0 }
 0x439   :  { %v1566_v20 = vpack.c.bf16 %v1533_v26, %v1532_v25  ;;  %v1756_v37 = vadd.f32 %v3638_v7, %v1755_v31 }
 0x43b   :  { %1794 = vmatmul.bf16.gmra.mxu0 %v1566_v20  ;;  %v1849_v41 = vmax.f32 %v1756_v37, 0.0 }
 0x43c   :  { %v1467_v34 = vpop.f32.mrf.mxu3 }
 0x43d   :  { %v2045_v35 = vpop.f32.mrf.mxu1  ;;  %v1468_v44 = vadd.f32 %v3547_v12, %v1467_v34 }
 0x43e   :  { %v2745_v36 = vpop.eup %2744  ;;  %v2046_v43 = vadd.f32 %v3489_v27, %v2045_v35 }
 0x43f   :  { %2228 = vst [vmem:[%s3863_s13 + $0xd0] sm:$0xff] %v2745_v36  ;;  %v1534_v50 = vmax.f32 %v1468_v44, 0.0 }
 0x440   :  { %2746 = vtanh.f32 %v2046_v43  ;;  %v1757_v38 = vpop.f32.mrf.mxu0 }
 0x441   :  { %v1758_v22 = vadd.f32 %v3638_v7, %v1757_v38 }
 0x443   :  { %v1850_v28 = vmax.f32 %v1758_v22, 0.0 }
 0x444   :  { %v1469_v45 = vpop.f32.mrf.mxu3 }
 0x445   :  { %v1891_v23 = vpack.c.bf16 %v1850_v28, %v1849_v41  ;;  %v1470_v30 = vadd.f32 %v3547_v12, %v1469_v45  ;;  %v2048_v21 = vpop.f32.mrf.mxu1 }
 0x446   :  { %v2747_v29 = vpop.eup %2746  ;;  %v2049_v47 = vadd.f32 %v3489_v27, %v2048_v21 }
 0x447   :  { %2229 = vst [vmem:[%s3863_s13 + $0xd8] sm:$0xff] %v2747_v29  ;;  %v1535_v51 = vmax.f32 %v1470_v30, 0.0  ;;  %2087 = vmatmul.bf16.gmra.mxu1 %v1891_v23 }
 0x448   :  { %2748 = vtanh.f32 %v2049_v47  ;;  %v1760_v52 = vpop.f32.mrf.mxu0 }
 0x449   :  { %v1567_v53 = vpack.c.bf16 %v1535_v51, %v1534_v50  ;;  %v1761_v12 = vadd.f32 %v3638_v7, %v1760_v52 }
 0x44b   :  { %1799 = vmatmul.bf16.gmra.mxu0 %v1567_v53  ;;  %v1851_v59 = vmax.f32 %v1761_v12, 0.0 }
 0x44d   :  { %v2050_v56 = vpop.f32.mrf.mxu1 }
 0x44e   :  { %v2749_v58 = vpop.eup %2748  ;;  %v2051_v62 = vadd.f32 %v3489_v27, %v2050_v56 }
 0x44f   :  { %2230 = vst [vmem:[%s3863_s13 + $0xe0] sm:$0xff] %v2749_v58 }
 0x450   :  { %2750 = vtanh.f32 %v2051_v62  ;;  %v1762_v19 = vpop.f32.mrf.mxu0 }
 0x451   :  { %v1763_v1 = vadd.f32 %v3638_v7, %v1762_v19 }
 0x453   :  { %v1852_v54 = vmax.f32 %v1763_v1, 0.0 }
 0x455   :  { %v1892_v6 = vpack.c.bf16 %v1852_v54, %v1851_v59  ;;  %v2053_v2 = vpop.f32.mrf.mxu1 }
 0x456   :  { %v2751_v39 = vpop.eup %2750  ;;  %v2054_v4 = vadd.f32 %v3489_v27, %v2053_v2 }
 0x457   :  { %2231 = vst [vmem:[%s3863_s13 + $0xe8] sm:$0xff] %v2751_v39  ;;  %2092 = vmatmul.bf16.gmra.mxu1 %v1892_v6 }
 0x458   :  { %2752 = vtanh.f32 %v2054_v4  ;;  %v1765_v48 = vpop.f32.mrf.mxu0 }
 0x459   :  { %v1766_v9 = vadd.f32 %v3638_v7, %v1765_v48 }
 0x45b   :  { %v1853_v11 = vmax.f32 %v1766_v9, 0.0 }
 0x45d   :  { %v2055_v32 = vpop.f32.mrf.mxu1 }
 0x45e   :  { %v2753_v42 = vpop.eup %2752  ;;  %v2056_v49 = vadd.f32 %v3489_v27, %v2055_v32 }
 0x45f   :  { %2232 = vst [vmem:[%s3863_s13 + $0xf0] sm:$0xff] %v2753_v42  ;;  %v3743_v42 = vld [vmem:[%s3862_s12] ss:$0 sm:$0xff] }
 0x460   :  { %2754 = vtanh.f32 %v2056_v49  ;;  %v1767_v8 = vpop.f32.mrf.mxu0 }
 0x461   :  { %v1768_v10 = vadd.f32 %v3638_v7, %v1767_v8 }
 0x463   :  { %v1854_v3 = vmax.f32 %v1768_v10, 0.0 }
 0x465   :  { %v1893_v46 = vpack.c.bf16 %v1854_v3, %v1853_v11  ;;  %v2058_v16 = vpop.f32.mrf.mxu1 }
 0x466   :  { %v2755_v0 = vpop.eup %2754  ;;  %v2059_v13 = vadd.f32 %v3489_v27, %v2058_v16 }
 0x467   :  { %2233 = vst [vmem:[%s3863_s13 + $0xf8] sm:$0xff] %v2755_v0  ;;  %2097 = vmatmul.bf16.gmra.mxu1 %v1893_v46 }
 0x468   :  { %2756 = vtanh.f32 %v2059_v13  ;;  %v1770_v40 = vpop.f32.mrf.mxu0 }
 0x469   :  { %v1771_v18 = vadd.f32 %v3638_v7, %v1770_v40 }
 0x46b   :  { %v1855_v17 = vmax.f32 %v1771_v18, 0.0 }
 0x46d   :  { %v2060_v33 = vpop.f32.mrf.mxu1 }
 0x46e   :  { %v2757_v15 = vpop.eup %2756  ;;  %v2061_v63 = vadd.f32 %v3489_v27, %v2060_v33 }
 0x46f   :  { %2234 = vst [vmem:[%s3863_s13 + $0x100] sm:$0xff] %v2757_v15 }
 0x470   :  { %2758 = vtanh.f32 %v2061_v63  ;;  %v1772_v60 = vpop.f32.mrf.mxu0 }
 0x471   :  { %v1773_v14 = vadd.f32 %v3638_v7, %v1772_v60 }
 0x473   :  { %v1856_v61 = vmax.f32 %v1773_v14, 0.0 }
 0x475   :  { %v1894_v55 = vpack.c.bf16 %v1856_v61, %v1855_v17  ;;  %v2063_v5 = vpop.f32.mrf.mxu1 }
 0x476   :  { %v2759_v57 = vpop.eup %2758  ;;  %v2064_v24 = vadd.f32 %v3489_v27, %v2063_v5 }
 0x477   :  { %2235 = vst [vmem:[%s3863_s13 + $0x108] sm:$0xff] %v2759_v57  ;;  %2102 = vmatmul.bf16.gmra.mxu1 %v1894_v55 }
 0x478   :  { %2760 = vtanh.f32 %v2064_v24  ;;  %v1775_v25 = vpop.f32.mrf.mxu0 }
 0x479   :  { %v1776_v34 = vadd.f32 %v3638_v7, %v1775_v25 }
 0x47b   :  { %v1857_v43 = vmax.f32 %v1776_v34, 0.0 }
 0x47d   :  { %v2065_v26 = vpop.f32.mrf.mxu1 }
 0x47e   :  { %v2761_v31 = vpop.eup %2760  ;;  %v2066_v20 = vadd.f32 %v3489_v27, %v2065_v26 }
 0x47f   :  { %2236 = vst [vmem:[%s3863_s13 + $0x110] sm:$0xff] %v2761_v31 }
 0x480   :  { %2762 = vtanh.f32 %v2066_v20  ;;  %v1777_v35 = vpop.f32.mrf.mxu0 }
 0x481   :  { %v1778_v36 = vadd.f32 %v3638_v7, %v1777_v35 }
 0x483   :  { %v1858_v37 = vmax.f32 %v1778_v36, 0.0 }
 0x485   :  { %v1895_v38 = vpack.c.bf16 %v1858_v37, %v1857_v43  ;;  %v2068_v22 = vpop.f32.mrf.mxu1 }
 0x486   :  { %v2763_v41 = vpop.eup %2762  ;;  %v2069_v44 = vadd.f32 %v3489_v27, %v2068_v22 }
 0x487   :  { %2237 = vst [vmem:[%s3863_s13 + $0x118] sm:$0xff] %v2763_v41  ;;  %2107 = vmatmul.bf16.gmra.mxu1 %v1895_v38 }
 0x488   :  { %2764 = vtanh.f32 %v2069_v44  ;;  %v1780_v28 = vpop.f32.mrf.mxu0 }
 0x489   :  { %v1781_v21 = vadd.f32 %v3638_v7, %v1780_v28 }
 0x48b   :  { %v1859_v50 = vmax.f32 %v1781_v21, 0.0 }
 0x48d   :  { %v2070_v45 = vpop.f32.mrf.mxu1 }
 0x48e   :  { %v2765_v23 = vpop.eup %2764  ;;  %v2071_v30 = vadd.f32 %v3489_v27, %v2070_v45 }
 0x48f   :  { %2238 = vst [vmem:[%s3863_s13 + $0x120] sm:$0xff] %v2765_v23 }
 0x490   :  { %2766 = vtanh.f32 %v2071_v30  ;;  %v1782_v29 = vpop.f32.mrf.mxu0 }
 0x491   :  { %v1783_v47 = vadd.f32 %v3638_v7, %v1782_v29 }
 0x493   :  { %v1860_v51 = vmax.f32 %v1783_v47, 0.0 }
 0x495   :  { %v1896_v52 = vpack.c.bf16 %v1860_v51, %v1859_v50  ;;  %v2073_v53 = vpop.f32.mrf.mxu1 }
 0x496   :  { %v2767_v56 = vpop.eup %2766  ;;  %v2074_v58 = vadd.f32 %v3489_v27, %v2073_v53 }
 0x497   :  { %2239 = vst [vmem:[%s3863_s13 + $0x128] sm:$0xff] %v2767_v56  ;;  %2112 = vmatmul.bf16.gmra.mxu1 %v1896_v52 }
 0x498   :  { %2768 = vtanh.f32 %v2074_v58  ;;  %v1785_v62 = vpop.f32.mrf.mxu0 }
 0x499   :  { %v1786_v59 = vadd.f32 %v3638_v7, %v1785_v62 }
 0x49b   :  { %v1861_v2 = vmax.f32 %v1786_v59, 0.0 }
 0x49d   :  { %v2075_v12 = vpop.f32.mrf.mxu1 }
 0x49e   :  { %v2769_v19 = vpop.eup %2768  ;;  %v2076_v1 = vadd.f32 %v3489_v27, %v2075_v12 }
 0x49f   :  { %2240 = vst [vmem:[%s3863_s13 + $0x130] sm:$0xff] %v2769_v19 }
 0x4a0   :  { %2770 = vtanh.f32 %v2076_v1  ;;  %v1787_v54 = vpop.f32.mrf.mxu0 }
 0x4a1   :  { %v1788_v6 = vadd.f32 %v3638_v7, %v1787_v54 }
 0x4a3   :  { %v1862_v39 = vmax.f32 %v1788_v6, 0.0 }
 0x4a5   :  { %v1897_v4 = vpack.c.bf16 %v1862_v39, %v1861_v2  ;;  %v2078_v48 = vpop.f32.mrf.mxu1 }
 0x4a6   :  { %v2771_v32 = vpop.eup %2770  ;;  %v2079_v27 = vadd.f32 %v3743_v42, %v2078_v48 }
 0x4a7   :  { %2241 = vst [vmem:[%s3863_s13 + $0x138] sm:$0xff] %v2771_v32  ;;  %2117 = vmatmul.bf16.gmra.mxu1 %v1897_v4 }
 0x4a8   :  { %2772 = vtanh.f32 %v2079_v27  ;;  %v1790_v49 = vpop.f32.mrf.mxu0 }
 0x4a9   :  { %v1791_v11 = vadd.f32 %v3638_v7, %v1790_v49 }
 0x4ab   :  { %v1863_v16 = vmax.f32 %v1791_v11, 0.0 }
 0x4ad   :  { %v2080_v9 = vpop.f32.mrf.mxu1 }
 0x4ae   :  { %v2773_v8 = vpop.eup %2772  ;;  %v2081_v10 = vadd.f32 %v3743_v42, %v2080_v9 }
 0x4af   :  { %2242 = vst [vmem:[%s3863_s13 + $0x140] sm:$0xff] %v2773_v8 }
 0x4b0   :  { %2774 = vtanh.f32 %v2081_v10  ;;  %v1792_v3 = vpop.f32.mrf.mxu0 }
 0x4b1   :  { %v1793_v46 = vadd.f32 %v3638_v7, %v1792_v3 }
 0x4b3   :  { %v1864_v0 = vmax.f32 %v1793_v46, 0.0 }
 0x4b5   :  { %v1898_v13 = vpack.c.bf16 %v1864_v0, %v1863_v16  ;;  %v2083_v40 = vpop.f32.mrf.mxu1 }
 0x4b6   :  { %v2775_v33 = vpop.eup %2774  ;;  %v2084_v15 = vadd.f32 %v3743_v42, %v2083_v40 }
 0x4b7   :  { %2243 = vst [vmem:[%s3863_s13 + $0x148] sm:$0xff] %v2775_v33  ;;  %2122 = vmatmul.bf16.gmra.mxu1 %v1898_v13 }
 0x4b8   :  { %2776 = vtanh.f32 %v2084_v15  ;;  %v1795_v63 = vpop.f32.mrf.mxu0 }
 0x4b9   :  { %v1796_v17 = vadd.f32 %v3638_v7, %v1795_v63 }
 0x4bb   :  { %v1865_v5 = vmax.f32 %v1796_v17, 0.0 }
 0x4bd   :  { %v2085_v18 = vpop.f32.mrf.mxu1 }
 0x4be   :  { %v2777_v60 = vpop.eup %2776  ;;  %v2086_v14 = vadd.f32 %v3743_v42, %v2085_v18 }
 0x4bf   :  { %2244 = vst [vmem:[%s3863_s13 + $0x150] sm:$0xff] %v2777_v60 }
 0x4c0   :  { %2778 = vtanh.f32 %v2086_v14  ;;  %v1797_v61 = vpop.f32.mrf.mxu0 }
 0x4c1   :  { %v1798_v55 = vadd.f32 %v3638_v7, %v1797_v61 }
 0x4c3   :  { %v1866_v57 = vmax.f32 %v1798_v55, 0.0 }
 0x4c5   :  { %v1899_v24 = vpack.c.bf16 %v1866_v57, %v1865_v5  ;;  %v2088_v25 = vpop.f32.mrf.mxu1 }
 0x4c6   :  { %v2779_v26 = vpop.eup %2778  ;;  %v2089_v31 = vadd.f32 %v3743_v42, %v2088_v25 }
 0x4c7   :  { %2245 = vst [vmem:[%s3863_s13 + $0x158] sm:$0xff] %v2779_v26  ;;  %2127 = vmatmul.bf16.gmra.mxu1 %v1899_v24 }
 0x4c8   :  { %2780 = vtanh.f32 %v2089_v31  ;;  %v1800_v20 = vpop.f32.mrf.mxu0 }
 0x4c9   :  { %v1801_v43 = vadd.f32 %v3638_v7, %v1800_v20 }
 0x4cb   :  { %v1867_v22 = vmax.f32 %v1801_v43, 0.0 }
 0x4cd   :  { %v2090_v34 = vpop.f32.mrf.mxu1 }
 0x4ce   :  { %v2781_v35 = vpop.eup %2780  ;;  %v2091_v36 = vadd.f32 %v3743_v42, %v2090_v34 }
 0x4cf   :  { %2246 = vst [vmem:[%s3863_s13 + $0x160] sm:$0xff] %v2781_v35 }
 0x4d0   :  { %2782 = vtanh.f32 %v2091_v36  ;;  %v1802_v37 = vpop.f32.mrf.mxu0 }
 0x4d1   :  { %v1803_v38 = vadd.f32 %v3638_v7, %v1802_v37 }
 0x4d3   :  { %v1868_v41 = vmax.f32 %v1803_v38, 0.0 }
 0x4d5   :  { %v1900_v44 = vpack.c.bf16 %v1868_v41, %v1867_v22  ;;  %v2093_v28 = vpop.f32.mrf.mxu1 }
 0x4d6   :  { %v2783_v45 = vpop.eup %2782  ;;  %v2094_v23 = vadd.f32 %v3743_v42, %v2093_v28 }
 0x4d7   :  { %2247 = vst [vmem:[%s3863_s13 + $0x168] sm:$0xff] %v2783_v45  ;;  %2132 = vmatmul.bf16.gmra.mxu1 %v1900_v44 }
 0x4d8   :  { %2784 = vtanh.f32 %v2094_v23 }
 0x4dd   :  { %v2095_v30 = vpop.f32.mrf.mxu1 }
 0x4de   :  { %v2785_v21 = vpop.eup %2784  ;;  %v2096_v29 = vadd.f32 %v3743_v42, %v2095_v30 }
 0x4df   :  { %2248 = vst [vmem:[%s3863_s13 + $0x170] sm:$0xff] %v2785_v21 }
 0x4e0   :  { %2786 = vtanh.f32 %v2096_v29 }
 0x4e5   :  { %v2098_v7 = vpop.f32.mrf.mxu1 }
 0x4e6   :  { %v2787_v47 = vpop.eup %2786  ;;  %v2099_v50 = vadd.f32 %v3743_v42, %v2098_v7 }
 0x4e7   :  { %2249 = vst [vmem:[%s3863_s13 + $0x178] sm:$0xff] %v2787_v47 }
 0x4e8   :  { %2788 = vtanh.f32 %v2099_v50 }
 0x4ed   :  { %v2100_v51 = vpop.f32.mrf.mxu1 }
 0x4ee   :  { %v2789_v52 = vpop.eup %2788  ;;  %v2101_v53 = vadd.f32 %v3743_v42, %v2100_v51 }
 0x4ef   :  { %2250 = vst [vmem:[%s3863_s13 + $0x180] sm:$0xff] %v2789_v52 }
 0x4f0   :  { %2790 = vtanh.f32 %v2101_v53 }
 0x4f5   :  { %v2103_v56 = vpop.f32.mrf.mxu1 }
 0x4f6   :  { %v2791_v58 = vpop.eup %2790  ;;  %v2104_v62 = vadd.f32 %v3743_v42, %v2103_v56 }
 0x4f7   :  { %2251 = vst [vmem:[%s3863_s13 + $0x188] sm:$0xff] %v2791_v58 }
 0x4f8   :  { %2792 = vtanh.f32 %v2104_v62 }
 0x4fd   :  { %v2105_v12 = vpop.f32.mrf.mxu1 }
 0x4fe   :  { %v2793_v19 = vpop.eup %2792  ;;  %v2106_v1 = vadd.f32 %v3743_v42, %v2105_v12 }
 0x4ff   :  { %2252 = vst [vmem:[%s3863_s13 + $0x190] sm:$0xff] %v2793_v19 }
 0x500   :  { %2794 = vtanh.f32 %v2106_v1 }
 0x505   :  { %v2108_v59 = vpop.f32.mrf.mxu1 }
 0x506   :  { %v2795_v54 = vpop.eup %2794  ;;  %v2109_v6 = vadd.f32 %v3743_v42, %v2108_v59 }
 0x507   :  { %2253 = vst [vmem:[%s3863_s13 + $0x198] sm:$0xff] %v2795_v54 }
 0x508   :  { %2796 = vtanh.f32 %v2109_v6 }
 0x50d   :  { %v2110_v2 = vpop.f32.mrf.mxu1 }
 0x50e   :  { %v2797_v39 = vpop.eup %2796  ;;  %v2111_v4 = vadd.f32 %v3743_v42, %v2110_v2 }
 0x50f   :  { %2254 = vst [vmem:[%s3863_s13 + $0x1a0] sm:$0xff] %v2797_v39 }
 0x510   :  { %2798 = vtanh.f32 %v2111_v4 }
 0x515   :  { %v2113_v48 = vpop.f32.mrf.mxu1 }
 0x516   :  { %v2799_v32 = vpop.eup %2798  ;;  %v2114_v27 = vadd.f32 %v3743_v42, %v2113_v48 }
 0x517   :  { %2255 = vst [vmem:[%s3863_s13 + $0x1a8] sm:$0xff] %v2799_v32 }
 0x518   :  { %2800 = vtanh.f32 %v2114_v27 }
 0x51d   :  { %v2115_v49 = vpop.f32.mrf.mxu1 }
 0x51e   :  { %v2801_v9 = vpop.eup %2800  ;;  %v2116_v8 = vadd.f32 %v3743_v42, %v2115_v49 }
 0x51f   :  { %2256 = vst [vmem:[%s3863_s13 + $0x1b0] sm:$0xff] %v2801_v9 }
 0x520   :  { %2802 = vtanh.f32 %v2116_v8 }
 0x525   :  { %v2118_v10 = vpop.f32.mrf.mxu1 }
 0x526   :  { %v2803_v11 = vpop.eup %2802  ;;  %v2119_v3 = vadd.f32 %v3743_v42, %v2118_v10 }
 0x527   :  { %2257 = vst [vmem:[%s3863_s13 + $0x1b8] sm:$0xff] %v2803_v11 }
 0x528   :  { %2804 = vtanh.f32 %v2119_v3 }
 0x52d   :  { %v2120_v46 = vpop.f32.mrf.mxu1 }
 0x52e   :  { %v2805_v16 = vpop.eup %2804  ;;  %v2121_v0 = vadd.f32 %v3743_v42, %v2120_v46 }
 0x52f   :  { %2258 = vst [vmem:[%s3863_s13 + $0x1c0] sm:$0xff] %v2805_v16 }
 0x530   :  { %2806 = vtanh.f32 %v2121_v0 }
 0x535   :  { %v2123_v13 = vpop.f32.mrf.mxu1 }
 0x536   :  { %v2807_v40 = vpop.eup %2806  ;;  %v2124_v33 = vadd.f32 %v3743_v42, %v2123_v13 }
 0x537   :  { %2259 = vst [vmem:[%s3863_s13 + $0x1c8] sm:$0xff] %v2807_v40 }
 0x538   :  { %2808 = vtanh.f32 %v2124_v33 }
 0x53d   :  { %v2125_v15 = vpop.f32.mrf.mxu1 }
 0x53e   :  { %v2809_v63 = vpop.eup %2808  ;;  %v2126_v18 = vadd.f32 %v3743_v42, %v2125_v15 }
 0x53f   :  { %2260 = vst [vmem:[%s3863_s13 + $0x1d0] sm:$0xff] %v2809_v63 }
 0x540   :  { %2810 = vtanh.f32 %v2126_v18 }
 0x545   :  { %v2128_v60 = vpop.f32.mrf.mxu1 }
 0x546   :  { %v2811_v14 = vpop.eup %2810  ;;  %v2129_v17 = vadd.f32 %v3743_v42, %v2128_v60 }
 0x547   :  { %2261 = vst [vmem:[%s3863_s13 + $0x1d8] sm:$0xff] %v2811_v14 }
 0x548   :  { %2812 = vtanh.f32 %v2129_v17 }
 0x54d   :  { %v2130_v61 = vpop.f32.mrf.mxu1 }
 0x54e   :  { %v2813_v55 = vpop.eup %2812  ;;  %v2131_v5 = vadd.f32 %v3743_v42, %v2130_v61 }
 0x54f   :  { %2262 = vst [vmem:[%s3863_s13 + $0x1e0] sm:$0xff] %v2813_v55 }
 0x550   :  { %2814 = vtanh.f32 %v2131_v5 }
 0x555   :  { %v2133_v57 = vpop.f32.mrf.mxu1 }
 0x556   :  { %v2815_v24 = vpop.eup %2814  ;;  %v2134_v25 = vadd.f32 %v3743_v42, %v2133_v57 }
 0x557   :  { %2263 = vst [vmem:[%s3863_s13 + $0x1e8] sm:$0xff] %v2815_v24 }
 0x558   :  { %2816 = vtanh.f32 %v2134_v25 }
 0x55d   :  { %v2135_v26 = vpop.f32.mrf.mxu1 }
 0x55e   :  { %v2817_v31 = vpop.eup %2816  ;;  %v2136_v20 = vadd.f32 %v3743_v42, %v2135_v26 }
 0x55f   :  { %2264 = vst [vmem:[%s3863_s13 + $0x1f0] sm:$0xff] %v2817_v31 }
 0x560   :  { %2818 = vtanh.f32 %v2136_v20 }
 0x566   :  { %v2819_v34 = vpop.eup %2818 }
 0x567   :  { %2265 = vst [vmem:[%s3863_s13 + $0x1f8] sm:$0xff] %v2819_v34 }

</bundles_post_ra>
